<compile_context>
chip_gen: v5e
topology: v5e:2x2
jax: 0.10.0
libtpu: 0.0.40
codegen_flags: <defaults>
</compile_context>

<pallas_src>
import jax
import jax.numpy as jnp
from jax.experimental import pallas as pl
from jax.experimental.pallas import tpu as pltpu

H = 768          # hidden size fixed by the module's init_mBloSA (768x768 linears)
EPS = 1e-6       # LayerNorm eps


def _sublayer_connection_kernel(x_ref, a2_ref, b2_ref, w_ref, bs_ref,
                                ret_ref, aux_ref):
    # x_ref: (tm, H) tile of rows, w_ref: (H, H) bf16 weight laid out (in, out)
    x = x_ref[...].astype(jnp.float32)

    # --- LayerNorm (two-pass, numerically safe; unbiased std, eps on std) ---
    mean = jnp.sum(x, axis=-1, keepdims=True) * (1.0 / H)
    xc = x - mean
    var_unbiased = jnp.sum(xc * xc, axis=-1, keepdims=True) * (1.0 / (H - 1))
    std = jnp.sqrt(var_unbiased)
    y = a2_ref[...] * (xc / (std + EPS)) + b2_ref[...]          # norm(x), f32

    # Store aux immediately: shortens the live ranges of x / y across the
    # 768-deep MXU pass (avoids vreg spill traffic, matters most on v5e).
    aux_ref[...] = y.astype(aux_ref.dtype)

    # --- sublayer: Linear(768 -> 768) on the MXU, bf16 operands / f32 accum ---
    sub0 = jnp.dot(y.astype(jnp.bfloat16), w_ref[...],
                   preferred_element_type=jnp.float32) + bs_ref[...]

    # --- residual connection; re-read x from VMEM instead of keeping it live ---
    # TODO(synk): training-mode dropout (p > 0) not implemented; eval semantics only.
    ret_ref[...] = (x_ref[...].astype(jnp.float32) + sub0).astype(ret_ref.dtype)


def _choose_row_tile(rows, tm_max):
    """Pick (tm, rows_pad): tm multiple of 8, ideally dividing rows with >=2 steps."""
    rows8 = ((rows + 7) // 8) * 8
    tm_cap = max(8, (min(tm_max, rows8) // 8) * 8)
    # 1) large tile that divides rows8 exactly and gives >= 2 grid steps (no pad)
    for cand in range(tm_cap, 127, -8):
        if rows8 % cand == 0 and rows8 // cand >= 2:
            return cand, rows8
    # 2) small inputs: split in two (if possible) so pipelining / megacore engage
    if rows8 <= tm_cap:
        half = ((rows8 // 2) // 8) * 8
        if half >= 8 and rows8 % half == 0:
            return half, rows8
        return rows8, rows8
    # 3) awkward row counts: pad rows up to a multiple of tm_cap
    rows_pad = ((rows8 + tm_cap - 1) // tm_cap) * tm_cap
    return tm_cap, rows_pad


def _vmem_limit_bytes(tm, out_itemsize):
    x_buf = 2 * tm * H * 4                      # double-buffered f32 input tile
    out_buf = 2 * 2 * tm * H * out_itemsize     # two outputs, double-buffered
    w_buf = H * H * 2                           # single-buffered bf16 weight
    small = 6 * 2 * H * 4                       # broadcast param rows
    est = x_buf + out_buf + w_buf + small
    # headroom for compiler scratch; clamp so v7x's 64 MiB physical VMEM is safe
    return int(min(max(est * 3 // 2 + (4 << 20), 24 << 20), 48 << 20))


def sublayer_connection(x, a2, b2, w_in_out, b_sub, *, tm_max=512, out_dtype=None):
    """x: (B, S, 768). w_in_out: (768, 768) laid out (in, out), ideally bf16.

    Returns (ret, aux) == (x + norm(x) @ W + b, norm(x)), both (B, S, 768).
    """
    B, S, Hx = x.shape
    assert Hx == H, f"hidden size must be {H}"
    out_dtype = x.dtype if out_dtype is None else out_dtype
    rows = B * S

    tm, rows_pad = _choose_row_tile(rows, tm_max)
    x2 = x.reshape(rows, H)
    if rows_pad != rows:
        # Padded rows are zeros; LayerNorm stays finite (eps on std), rows discarded.
        x2 = jnp.pad(x2, ((0, rows_pad - rows), (0, 0)))

    a2_2d = a2.reshape(1, H).astype(jnp.float32)
    b2_2d = b2.reshape(1, H).astype(jnp.float32)
    bs_2d = b_sub.reshape(1, H).astype(jnp.float32)
    # Weight should be pre-cast to bf16 once at parameter setup; fallback cast only.
    w_bf16 = w_in_out if w_in_out.dtype == jnp.bfloat16 else w_in_out.astype(jnp.bfloat16)

    grid = (rows_pad // tm,)
    row_spec = pl.BlockSpec((tm, H), lambda i: (i, 0))
    bcast_spec = pl.BlockSpec((1, H), lambda i: (0, 0))
    # Grid-constant weight: block index never changes -> single VMEM buffer.
    w_spec = pl.BlockSpec((H, H), lambda i: (0, 0), pipeline_mode=pl.Buffered(1))

    ret2, aux2 = pl.pallas_call(
        _sublayer_connection_kernel,
        out_shape=(jax.ShapeDtypeStruct((rows_pad, H), out_dtype),
                   jax.ShapeDtypeStruct((rows_pad, H), out_dtype)),
        grid_spec=pltpu.PrefetchScalarGridSpec(
            num_scalar_prefetch=0,
            grid=grid,
            in_specs=[row_spec, bcast_spec, bcast_spec, w_spec, bcast_spec],
            out_specs=[row_spec, row_spec],
        ),
        compiler_params=pltpu.CompilerParams(
            dimension_semantics=("parallel",),   # rows shard across TCs on v7x
            vmem_limit_bytes=_vmem_limit_bytes(tm, jnp.dtype(out_dtype).itemsize)),
    )(x2, a2_2d, b2_2d, w_bf16, bs_2d)

    if rows_pad != rows:
        ret2 = ret2[:rows]
        aux2 = aux2[:rows]
    return ret2.reshape(B, S, H), aux2.reshape(B, S, H)


if __name__ == "__main__":
    key = jax.random.PRNGKey(0)
    k_x, k_w = jax.random.split(key)

    B, S = 2, 8
    x = jax.random.normal(k_x, (B, S, H), dtype=jnp.float32)

    # LayerNorm params (PyTorch init: ones / zeros)
    a2 = jnp.ones((H,), dtype=jnp.float32)
    b2 = jnp.zeros((H,), dtype=jnp.float32)

    # Sublayer linear params: xavier_uniform weight, zero bias (as in customizedLinear)
    bound = (6.0 / (H + H)) ** 0.5
    w_torch = jax.random.uniform(k_w, (H, H), dtype=jnp.float32,
                                 minval=-bound, maxval=bound)   # PyTorch (out, in)
    w_in_out = w_torch.T                                        # (in, out) for y @ W
    w_bf16 = w_in_out.astype(jnp.bfloat16)   # pre-cast once (parameter setup time)
    b_sub = jnp.zeros((H,), dtype=jnp.float32)

    ret, aux = sublayer_connection(x, a2, b2, w_bf16, b_sub)
    jax.block_until_ready((ret, aux))

    # reference check in plain JAX (f32 end-to-end, same PyTorch semantics)
    mean = jnp.mean(x, axis=-1, keepdims=True)
    xc = x - mean
    std = jnp.sqrt(jnp.sum(xc * xc, axis=-1, keepdims=True) / (H - 1))
    y_ref = a2 * xc / (std + EPS) + b2
    sub0_ref = y_ref @ w_in_out + b_sub
    ret_ref = x + sub0_ref

    # aux is computed fully in f32 with an exact divide -> tight tolerance
    assert jnp.allclose(aux, y_ref, atol=2e-3, rtol=2e-3), "aux mismatch"
    # ret goes through a bf16-operand / f32-accumulate matmul -> looser tolerance
    assert jnp.allclose(ret, ret_ref, atol=5e-2, rtol=5e-2), "ret mismatch"

    print("KERNEL_OK")
</pallas_src>

<mosaic_0001>
module attributes {stable_mosaic.version = 11 : i64} {
  func.func @_sublayer_connection_kernel(%arg0: i32, %arg1: memref<8x768xf32, #tpu.memory_space<vmem>>, %arg2: memref<1x768xf32, #tpu.memory_space<vmem>>, %arg3: memref<1x768xf32, #tpu.memory_space<vmem>>, %arg4: memref<768x768xbf16, #tpu.memory_space<vmem>>, %arg5: memref<1x768xf32, #tpu.memory_space<vmem>>, %arg6: memref<8x768xf32, #tpu.memory_space<vmem>>, %arg7: memref<8x768xf32, #tpu.memory_space<vmem>>) attributes {dimension_semantics = [#tpu.dimension_semantics<parallel>], iteration_bounds = array<i64: 2>, scalar_prefetch = 0 : i64, scratch_operands = 0 : i64, tpu.core_type = #tpu.core_type<tc>, window_params = [{transform_indices = @transform_0, window_bounds = array<i64: 8, 768>}, {pipeline_mode = #tpu.pipeline_mode<synchronous>, transform_indices = @transform_1, window_bounds = array<i64: 1, 768>}, {pipeline_mode = #tpu.pipeline_mode<synchronous>, transform_indices = @transform_2, window_bounds = array<i64: 1, 768>}, {pipeline_mode = #tpu.pipeline_mode<synchronous>, transform_indices = @transform_3, window_bounds = array<i64: 768, 768>}, {pipeline_mode = #tpu.pipeline_mode<synchronous>, transform_indices = @transform_4, window_bounds = array<i64: 1, 768>}, {transform_indices = @transform_5, window_bounds = array<i64: 8, 768>}, {transform_indices = @transform_6, window_bounds = array<i64: 8, 768>}]} {
    %c0 = arith.constant 0 : index
    %c0_0 = arith.constant 0 : index
    %0 = vector.load %arg1[%c0, %c0_0] : memref<8x768xf32, #tpu.memory_space<vmem>>, vector<8x768xf32>
    %cst = arith.constant dense<0.000000e+00> : vector<8xf32>
    %1 = vector.multi_reduction <add>, %0, %cst [1] : vector<8x768xf32> to vector<8xf32>
    %2 = vector.shape_cast %1 : vector<8xf32> to vector<8x1xf32>
    %cst_1 = arith.constant 0.00130208337 : f32
    %3 = vector.broadcast %cst_1 : f32 to vector<8x1xf32>
    %4 = arith.mulf %2, %3 : vector<8x1xf32>
    %5 = vector.broadcast %4 : vector<8x1xf32> to vector<8x768xf32>
    %6 = arith.subf %0, %5 : vector<8x768xf32>
    %7 = arith.mulf %6, %6 : vector<8x768xf32>
    %cst_2 = arith.constant dense<0.000000e+00> : vector<8xf32>
    %8 = vector.multi_reduction <add>, %7, %cst_2 [1] : vector<8x768xf32> to vector<8xf32>
    %9 = vector.shape_cast %8 : vector<8xf32> to vector<8x1xf32>
    %cst_3 = arith.constant 0.00130378094 : f32
    %10 = vector.broadcast %cst_3 : f32 to vector<8x1xf32>
    %11 = arith.mulf %9, %10 : vector<8x1xf32>
    %12 = math.sqrt %11 : vector<8x1xf32>
    %c0_4 = arith.constant 0 : index
    %c0_5 = arith.constant 0 : index
    %13 = vector.load %arg2[%c0_4, %c0_5] : memref<1x768xf32, #tpu.memory_space<vmem>>, vector<1x768xf32>
    %cst_6 = arith.constant 9.99999997E-7 : f32
    %14 = vector.broadcast %cst_6 : f32 to vector<8x1xf32>
    %15 = arith.addf %12, %14 : vector<8x1xf32>
    %16 = vector.broadcast %15 : vector<8x1xf32> to vector<8x768xf32>
    %17 = arith.divf %6, %16 : vector<8x768xf32>
    %18 = vector.broadcast %13 : vector<1x768xf32> to vector<8x768xf32>
    %19 = arith.mulf %18, %17 : vector<8x768xf32>
    %c0_7 = arith.constant 0 : index
    %c0_8 = arith.constant 0 : index
    %20 = vector.load %arg3[%c0_7, %c0_8] : memref<1x768xf32, #tpu.memory_space<vmem>>, vector<1x768xf32>
    %21 = vector.broadcast %20 : vector<1x768xf32> to vector<8x768xf32>
    %22 = arith.addf %19, %21 : vector<8x768xf32>
    %c0_9 = arith.constant 0 : index
    %c0_10 = arith.constant 0 : index
    %23 = vector.load %arg7[%c0_9, %c0_10] : memref<8x768xf32, #tpu.memory_space<vmem>>, vector<8x768xf32>
    tpu.vector_store %arg7[%c0_9, %c0_10], %22 {strides = array<i32>} : memref<8x768xf32, #tpu.memory_space<vmem>>, vector<8x768xf32>,
    %24 = arith.truncf %22 : vector<8x768xf32> to vector<8x768xbf16>
    %c0_11 = arith.constant 0 : index
    %c0_12 = arith.constant 0 : index
    %25 = vector.load %arg4[%c0_11, %c0_12] : memref<768x768xbf16, #tpu.memory_space<vmem>>, vector<768x768xbf16>
    %cst_13 = arith.constant dense<0.000000e+00> : vector<8x768xf32>
    %26 = tpu.matmul %24, %25, %cst_13 {dimension_numbers = #tpu.dot_dimension_numbers<[1], [0], [0], [1], [0, 0, 1, 1], [], []>} : vector<8x768xbf16>, vector<768x768xbf16>, vector<8x768xf32> -> vector<8x768xf32>
    %c0_14 = arith.constant 0 : index
    %c0_15 = arith.constant 0 : index
    %27 = vector.load %arg5[%c0_14, %c0_15] : memref<1x768xf32, #tpu.memory_space<vmem>>, vector<1x768xf32>
    %28 = vector.broadcast %27 : vector<1x768xf32> to vector<8x768xf32>
    %29 = arith.addf %26, %28 : vector<8x768xf32>
    %c0_16 = arith.constant 0 : index
    %c0_17 = arith.constant 0 : index
    %30 = vector.load %arg1[%c0_16, %c0_17] : memref<8x768xf32, #tpu.memory_space<vmem>>, vector<8x768xf32>
    %31 = arith.addf %30, %29 : vector<8x768xf32>
    %c0_18 = arith.constant 0 : index
    %c0_19 = arith.constant 0 : index
    %32 = vector.load %arg6[%c0_18, %c0_19] : memref<8x768xf32, #tpu.memory_space<vmem>>, vector<8x768xf32>
    tpu.vector_store %arg6[%c0_18, %c0_19], %31 {strides = array<i32>} : memref<8x768xf32, #tpu.memory_space<vmem>>, vector<8x768xf32>,
    return
  }
  func.func @transform_0(%arg0: i32) -> (i32, i32) {
    %c0_i32 = arith.constant 0 : i32
    %c0_i32_0 = arith.constant 0 : i32
    return %arg0, %c0_i32 : i32, i32
  }
  func.func @transform_1(%arg0: i32) -> (i32, i32) {
    %c0_i32 = arith.constant 0 : i32
    %c0_i32_0 = arith.constant 0 : i32
    %c0_i32_1 = arith.constant 0 : i32
    return %c0_i32, %c0_i32_0 : i32, i32
  }
  func.func @transform_2(%arg0: i32) -> (i32, i32) {
    %c0_i32 = arith.constant 0 : i32
    %c0_i32_0 = arith.constant 0 : i32
    %c0_i32_1 = arith.constant 0 : i32
    return %c0_i32, %c0_i32_0 : i32, i32
  }
  func.func @transform_3(%arg0: i32) -> (i32, i32) {
    %c0_i32 = arith.constant 0 : i32
    %c0_i32_0 = arith.constant 0 : i32
    %c0_i32_1 = arith.constant 0 : i32
    return %c0_i32, %c0_i32_0 : i32, i32
  }
  func.func @transform_4(%arg0: i32) -> (i32, i32) {
    %c0_i32 = arith.constant 0 : i32
    %c0_i32_0 = arith.constant 0 : i32
    %c0_i32_1 = arith.constant 0 : i32
    return %c0_i32, %c0_i32_0 : i32, i32
  }
  func.func @transform_5(%arg0: i32) -> (i32, i32) {
    %c0_i32 = arith.constant 0 : i32
    %c0_i32_0 = arith.constant 0 : i32
    return %arg0, %c0_i32 : i32, i32
  }
  func.func @transform_6(%arg0: i32) -> (i32, i32) {
    %c0_i32 = arith.constant 0 : i32
    %c0_i32_0 = arith.constant 0 : i32
    return %arg0, %c0_i32 : i32, i32
  }
}

</mosaic_0001>

<bundles_post_ra>
// kernel: tpu_custom_call.1
= control target key start
LH: loop header
LB: loop body
LE: loop exit
PB: predicated region body
PF: predicated region fallthrough
CT: control target
= control target key end

     0   :  { %s5060_s0 = inlined_call_operand.hbm [shape: f32[16,768], index: 0, kind: input, shape index: {}]   ;;  %s5061_s1 = inlined_call_operand.hbm [shape: f32[1,768], index: 1, kind: input, shape index: {}]   ;;  %s5062_s2 = inlined_call_operand.hbm [shape: f32[1,768], index: 2, kind: input, shape index: {}]   ;;  %s5063_s3 = inlined_call_operand.hbm [shape: bf16[768,768], index: 3, kind: input, shape index: {}]   ;;  %s5064_s4 = inlined_call_operand.hbm [shape: f32[1,768], index: 4, kind: input, shape index: {}]   ;;  %s5065_s5 = inlined_call_operand.hbm [shape: f32[16,768], index: 5, kind: output, shape index: {0}]   ;;  %s5066_s6 = inlined_call_operand.hbm [shape: f32[16,768], index: 6, kind: output, shape index: {1}]  }
   0x1   :  { %5067 = sst [smem:[#allocation19_spill]] %s5061_s1 }
   0x2   :  { %5068 = sst [smem:[#allocation20_spill]] %s5062_s2 }
   0x3   :  { %12 = vsyncpa [#allocation3], 0 }
   0x4   :  { %14 = vsyncpa [#allocation3 + $0x1], 0 }
   0x5   :  { %15 = vsyncpa [#allocation6], 0 }
   0x6   :  { %16 = vsyncpa [#allocation9], 0 }
   0x7   :  { %17 = vsyncpa [#allocation4], 0 }
   0x8   :  { %19 = vsyncpa [#allocation4 + $0x1], 0 }
   0x9   :  { %20 = vsyncpa [#allocation13], 0 }
   0xa   :  { %22 = vsyncpa [#allocation13 + $0x1], 0  ;;  %s4725_s21 = smov 0   ;;  %s4727_s22 = smov 0  }
   0xb   :  { %s4729_s23 = smov 0   ;;  %s4731_s24 = smov 0  }
   0xc LB: > { %s5069_s1 = sld [smem:[#allocation19_spill]]  ;;  %s4749_s28 = sadd.s32 4294967295, %s4682_s24   ;;  %s4682_s24 = sphi %s4731_s24, %s5081_s24   ;;  %s4678_s23 = sphi %s4729_s23, %s5080_s23   ;;  %s4674_s22 = sphi %s4727_s22, %s5079_s22   ;;  %s4670_s21 = sphi %s4725_s21, %s5078_s21  }
   0xd   : > { %p2867_p0 = scmp.ge.s32.totalorder %s4682_s24, 1  ;;  %p49_p1 = scmp.eq.s32.totalorder %s4749_s28, 0 }
   0xe   : > { %p195_p2 = scmp.lt.s32.totalorder %s4682_s24, 3  ;;  %s4684_s30 = smov [#allocation5]  }
   0xf   : > { %s209_s7 = sshll.u32 %s4684_s30, 4  ;;  %s230_s10 = sshll.u32 %s5063_s3, 4  ;;  %s210_s7 = int_to_ptr.vmem [resolvable:$true] %s209_s7  ;;  %s231_s10 = int_to_ptr.hbm [resolvable:$true] %s230_s10 }
  0x10   : > { %p4754_p3 = pnand %p2867_p0, %p195_p2  ;;  %s4685_s12 = smov [#allocation8]  }
  0x11   : > { %s232_s13 = sshll.u32 %s4685_s12, 4  ;;  %s4686_s14 = smov 384   ;;  %s233_s13 = int_to_ptr.vmem [resolvable:$true] %s232_s13 }
  0x12   : > { %s207_s27 = sshll.u32 %s5069_s1, 4  ;;  %p4350_p5 = pneg %p4754_p3  ;;  %s208_s27 = int_to_ptr.hbm [resolvable:$true] %s207_s27 }
  0x13   : > { %s4687_s15 = smov 24   ;;  %s5072_s2 = sld [smem:[#allocation20_spill]] }
  0x14   : > { %p4766_p6 = pnand %p4350_p5, %p49_p1  ;;  %s4688_s19 = smov [#allocation7]  }
  0x15   : > { %s221_s20 = sshll.u32 %s4688_s19, 4  ;;  %s4689_s30 = smov [#allocation10]   ;;  %s222_s20 = int_to_ptr.vmem [resolvable:$true] %s221_s20 }
  0x16   : > { %4353 = dma.hbm_to_vmem [thread:$0]  (!%p4766_p6), %s208_s27, 96, %s210_s7, [#allocation6]  }
  0x17   : > { %4359 = dma.hbm_to_vmem [thread:$0]  (!%p4766_p6), %s231_s10, 36864, %s233_s13, [#allocation9], %s4686_s14, %s4686_s14, %s4687_s15  }
  0x18   : > { %s245_s27 = sshll.u32 %s5064_s4, 4  ;;  %s247_s7 = sshll.u32 %s4689_s30, 4  ;;  %s246_s27 = int_to_ptr.hbm [resolvable:$true] %s245_s27  ;;  %s248_s7 = int_to_ptr.vmem [resolvable:$true] %s247_s7 }
  0x19   : > { %s219_s18 = sshll.u32 %s5072_s2, 4  ;;  %s2866_s8 = sadd.s32 4294967294, %s4682_s24   ;;  %s220_s18 = int_to_ptr.hbm [resolvable:$true] %s219_s18 }
  0x1a   : > { %4356 = dma.hbm_to_vmem [thread:$0]  (!%p4766_p6), %s220_s18, 96, %s222_s20, [#allocation6]  }
  0x1b   : > { %4362 = dma.hbm_to_vmem [thread:$0]  (!%p4766_p6), %s246_s27, 96, %s248_s7, [#allocation9]  }
  0x1c   : > { %s4786_s9 = sadd.s32 1, %s4682_s24   ;;  %s35_s12 = sadd.s32 1, %s4678_s23 }
  0x1d   : > { %s32_s10 = ssub.s32 %s4682_s24, %s4786_s9  ;;  %p42_p8 = scmp.ne.s32.totalorder %s4678_s23, %s4674_s22 }
  0x1e   : > { %p33_p7 = scmp.eq.s32.totalorder %s32_s10, 0  ;;  %p43_p9 = scmp.eq.s32.totalorder %s4682_s24, 0 }
  0x1f   : > { %p48_p10 = scmp.ne.s32.totalorder %s4674_s22, %s4670_s21  ;;  %p156_p13 = scmp.eq.s32.totalorder %s4749_s28, 1 }
  0x20   : > { %s4797_s13 = scalar_select %p33_p7, %s4678_s23, %s35_s12  }
  0x21   : > { %p44_p11 = por %p43_p9, %p42_p8  ;;  %p4801_p12 = por %p49_p1, %p48_p10 }
  0x22   : > { %p162_p0 = scmp.eq.s32.totalorder %s2866_s8, 1  ;;  %p4378_p2 = scmp.lt.s32.totalorder %s4682_s24, 2 }
  0x23   : > { %s258_s11 = sand.u32 1, %s4678_s23   ;;  %p4808_p5 = por %p156_p13, %p42_p8 }
  0x24   : > { %p4812_p6 = por %p162_p0, %p48_p10  ;;  %s4323_s17 = smul.u32 48, %s258_s11 }
  0x25   : > { %s4324_s18 = smul.u32 48, %s4682_s24  ;;  %p4817_p7 = pnand %p4378_p2, %p44_p11 }
  0x26   : > { %s262_s27 = scalar_lea.vmem [#allocation2], %s4323_s17  ;;  %s259_s8 = scalar_lea.sflag [#allocation3], %s258_s11 }
  0x27   : > { %s267_s26 = scalar_lea.hbm %s5060_s0, %s4324_s18  ;;  %s271_s30 = sshll.u32 %s262_s27, 4  ;;  %s272_s30 = int_to_ptr.vmem [resolvable:$true] %s271_s30 }
  0x28   : > { %s269_s7 = sshll.u32 %s267_s26, 4  ;;  %p4550_p9 = pneg %p4817_p7  ;;  %s270_s7 = int_to_ptr.hbm [resolvable:$true] %s269_s7 }
  0x29   : > { %s4546_s10 = sshra.s32 %s270_s7, 4  ;;  %s4553_s20 = scalar_lea.hbm %s5060_s0, 96  ;;  %s4547_s10 = int_to_ptr.hbm [resolvable:$true] %s4546_s10 }
  0x2a   : > { %s4548_s12 = scalar_lea.hbm %s4547_s10, 48  ;;  %p4554_p13 = scmp.lt.s32.totalorder %s4547_s10, %s5060_s0 }
  0x2b   : > { %p4549_p8 = scmp.ne.s32.totalorder %s4547_s10, %s4548_s12  ;;  %p4555_p0 = scmp.lt.s32.totalorder %s4553_s20, %s4548_s12 }
  0x2d   : > { %p4551_p10 = pnand %p4550_p9, %p4549_p8  ;;  %p4556_p2 = por %p4555_p0, %p4554_p13 }
  0x2f   : > { %p4552_p11 = pneg %p4551_p10 }
  0x31   : > { %p4557_p4 = pnand %p4556_p2, %p4552_p11 }
  0x33   : > { %4560 = shalt.err (!%p4557_p4)
}
  0x34   : > { %4366 = dma.hbm_to_vmem [thread:$0]  (!%p4817_p7), %s270_s7, 768, %s272_s30, %s259_s8  }
  0x35   : > { %280 = sbr.rel (%p4754_p3) target bundleno = 740 (0x2e4), region = 40  ;;  %s4837_s11 = sand.u32 (!%p4754_p3), 1, %s4674_s22  }
  0x36   : > { %s4840_s1 = smul.u32 (!%p4754_p3), 48, %s4837_s11  ;;  %s283_s2 = scalar_lea.sflag (!%p4754_p3), [#allocation3], %s4837_s11 }
  0x38   : > { %s4844_s17 = scalar_lea.vmem (!%p4754_p3), [#allocation2], %s4840_s1 }
  0x3a   : > { %4649 = dma.done.wait (%p4801_p12), %s283_s2, 768  }
  0x3b   : > { %4651 = vsyncadd (%p4801_p12), %s283_s2, 4294966528 }
  0x3c   : > { %4653 = dma.done.wait (%p49_p1), [#allocation6], 192  }
  0x3d   : > { %4655 = vsyncadd (%p49_p1), [#allocation6], 4294967104 }
  0x3e   : > { %4657 = dma.done.wait (%p49_p1), [#allocation9], 36960  }
  0x3f   : > { %4659 = vsyncadd (%p49_p1), [#allocation9], 4294930336  ;;  %v341_v0 = vld [vmem:[%s4844_s17] sm:$0xff]  ;;  %v342_v1 = vld [vmem:[%s4844_s17 + $0x8] sm:$0xff]  ;;  %s4914_s29 = scalar_lea.vmem [#allocation12], %s4840_s1  ;;  %s4971_s14 = scalar_lea.vmem [#allocation11], %s4840_s1 }
  0x40   : > { %v343_v2 = vld [vmem:[%s4844_s17 + $0x10] sm:$0xff]  ;;  %v347_v3 = vadd.f32 %v342_v1, %v341_v0  ;;  %v344_v4 = vld [vmem:[%s4844_s17 + $0x18] sm:$0xff]  ;;  %v345_v6 = vld [vmem:[%s4844_s17 + $0x20] sm:$0xff]  ;;  %s4326_s19 = smul.u32 48, %s4749_s28  ;;  %s2722_s7 = sshll.u32 %s4914_s29, 4  ;;  %s2723_s7 = int_to_ptr.vmem [resolvable:$true] %s2722_s7 }
  0x41   : > { %v346_v8 = vld [vmem:[%s4844_s17 + $0x28] sm:$0xff]  ;;  %v4080_v12 = vld [vmem:[#allocation8 + $0x164] sm:$0xf0]  ;;  %v4074_v24 = vld [vmem:[#allocation8 + $0x134] sm:$0xf0]  ;;  %s2694_s10 = scalar_lea.sflag [#allocation13], %s4837_s11 }
  0x42   : > { %v348_v5 = vadd.f32 %v347_v3, %v343_v2  ;;  %v3049_v11 = vld [vmem:[#allocation8 + $0x150] sm:$0xf]  ;;  %v4128_v15 = vld [vmem:[#allocation8 + $0x2e4] sm:$0xf0]  ;;  %v3025_v22 = vld [vmem:[#allocation8 + $0x120] sm:$0xf]  ;;  %s2720_s30 = scalar_lea.hbm %s5066_s6, %s4326_s19 }
  0x43   : > { %v3241_v13 = vld [vmem:[#allocation8 + $0x2d0] sm:$0xf]  ;;  %v3050_v14 = vor.u32 %v4080_v12, %v3049_v11  ;;  %v4176_v17 = vld [vmem:[#allocation8 + $0x464] sm:$0xf0]  ;;  %v3217_v25 = vld [vmem:[#allocation8 + $0x2a0] sm:$0xf]  ;;  %v3026_v27 = vor.u32 %v4074_v24, %v3025_v22 }
  0x44   : > { %v349_v7 = vadd.f32 %v348_v5, %v344_v4  ;;  %v3433_v16 = vld [vmem:[#allocation8 + $0x450] sm:$0xf]  ;;  %v3242_v18 = vor.u32 %v4128_v15, %v3241_v13  ;;  %v4224_v21 = vld [vmem:[#allocation8 + $0x5e4] sm:$0xf0]  ;;  %v4122_v26 = vld [vmem:[#allocation8 + $0x2b4] sm:$0xf0] }
  0x45   : > { %v3434_v19 = vor.u32 %v4176_v17, %v3433_v16  ;;  %v3625_v20 = vld [vmem:[#allocation8 + $0x5d0] sm:$0xf]  ;;  %2202 = vmatpush.bf16.msra.mxu0 %v3050_v14  ;;  %v3218_v28 = vor.u32 %v4122_v26, %v3217_v25  ;;  %v3409_v29 = vld [vmem:[#allocation8 + $0x420] sm:$0xf]  ;;  %v4170_v30 = vld [vmem:[#allocation8 + $0x434] sm:$0xf0] }
  0x46   : > { %v350_v9 = vadd.f32 %v349_v7, %v345_v6  ;;  %v3626_v23 = vor.u32 %v4224_v21, %v3625_v20  ;;  %2215 = vmatpush.bf16.msra.mxu1 %v3242_v18  ;;  %v3601_v31 = vld [vmem:[#allocation8 + $0x5a0] sm:$0xf]  ;;  %v3410_v32 = vor.u32 %v4170_v30, %v3409_v29  ;;  %v4218_v33 = vld [vmem:[#allocation8 + $0x5b4] sm:$0xf0]  ;;  %v3001_v54 = vld [vmem:[#allocation8 + $0xf0] sm:$0xf] }
  0x47   : > { %2228 = vmatpush.bf16.msra.mxu2 %v3434_v19  ;;  %v3602_v34 = vor.u32 %v4218_v33, %v3601_v31  ;;  %v4068_v55 = vld [vmem:[#allocation8 + $0x104] sm:$0xf0]  ;;  %v3193_v56 = vld [vmem:[#allocation8 + $0x270] sm:$0xf]  ;;  %v4062_v3 = vld [vmem:[#allocation8 + $0xd4] sm:$0xf0] }
  0x48   : > { %v351_v10 = vadd.f32 %v350_v9, %v346_v8  ;;  %2241 = vmatpush.bf16.msra.mxu3 %v3626_v23  ;;  %v3002_v57 = vor.u32 %v4068_v55, %v3001_v54  ;;  %v4116_v58 = vld [vmem:[#allocation8 + $0x284] sm:$0xf0]  ;;  %v3385_v59 = vld [vmem:[#allocation8 + $0x3f0] sm:$0xf]  ;;  %v3361_v7 = vld [vmem:[#allocation8 + $0x3c0] sm:$0xf] }
  0x49   : > { %2203 = vmatpush.bf16.msra.mxu0 %v3026_v27  ;;  %v4164_v60 = vld [vmem:[#allocation8 + $0x404] sm:$0xf0]  ;;  %v3194_v61 = vor.u32 %v4116_v58, %v3193_v56  ;;  %v3577_v63 = vld [vmem:[#allocation8 + $0x570] sm:$0xf]  ;;  %v3553_v11 = vld [vmem:[#allocation8 + $0x540] sm:$0xf] }
  0x4a   : > { %352 = vadd.xlane.f32.xlu0 %v351_v10  ;;  %2216 = vmatpush.bf16.msra.mxu1 %v3218_v28  ;;  %v3386_v62 = vor.u32 %v4164_v60, %v3385_v59  ;;  %v4206_v12 = vld [vmem:[#allocation8 + $0x554] sm:$0xf0]  ;;  %v2953_v14 = vld [vmem:[#allocation8 + $0x90] sm:$0xf]  ;;  %v4056_v15 = vld [vmem:[#allocation8 + $0xa4] sm:$0xf0] }
  0x4b   : > { %2229 = vmatpush.bf16.msra.mxu2 %v3410_v32  ;;  %v3554_v13 = vor.u32 %v4206_v12, %v3553_v11  ;;  %v3145_v16 = vld [vmem:[#allocation8 + $0x210] sm:$0xf]  ;;  %v2954_v17 = vor.u32 %v4056_v15, %v2953_v14  ;;  %v4104_v18 = vld [vmem:[#allocation8 + $0x224] sm:$0xf0]  ;;  %v2929_v26 = vld [vmem:[#allocation8 + $0x60] sm:$0xf] }
  0x4c   : > { %2242 = vmatpush.bf16.msra.mxu3 %v3602_v34  ;;  %v3337_v19 = vld [vmem:[#allocation8 + $0x390] sm:$0xf]  ;;  %v4152_v20 = vld [vmem:[#allocation8 + $0x3a4] sm:$0xf0]  ;;  %v3146_v21 = vor.u32 %v4104_v18, %v3145_v16  ;;  %v4050_v27 = vld [vmem:[#allocation8 + $0x74] sm:$0xf0] }
  0x4d   : > { %2204 = vmatpush.bf16.msra.mxu0 %v3002_v57  ;;  %v3338_v22 = vor.u32 %v4152_v20, %v3337_v19  ;;  %v3529_v23 = vld [vmem:[#allocation8 + $0x510] sm:$0xf]  ;;  %v4200_v24 = vld [vmem:[#allocation8 + $0x524] sm:$0xf0]  ;;  %v3121_v28 = vld [vmem:[#allocation8 + $0x1e0] sm:$0xf]  ;;  %v2930_v29 = vor.u32 %v4050_v27, %v2929_v26 }
  0x4e   : > { %2217 = vmatpush.bf16.msra.mxu1 %v3194_v61  ;;  %v3530_v25 = vor.u32 %v4200_v24, %v3529_v23  ;;  %v4098_v30 = vld [vmem:[#allocation8 + $0x1f4] sm:$0xf0]  ;;  %v3313_v31 = vld [vmem:[#allocation8 + $0x360] sm:$0xf]  ;;  %v4188_v54 = vld [vmem:[#allocation8 + $0x4c4] sm:$0xf0] }
  0x4f   : > { %2230 = vmatpush.bf16.msra.mxu2 %v3386_v62  ;;  %v4146_v32 = vld [vmem:[#allocation8 + $0x374] sm:$0xf0]  ;;  %v3122_v33 = vor.u32 %v4098_v30, %v3121_v28  ;;  %v2881_v56 = vld [vmem:[#allocation8] sm:$0xf]  ;;  %v3051_v11 = vld [vmem:[#allocation8 + $0x168] sm:$0xf0] }
  0x50   : > { %v3314_v34 = vor.u32 %v4146_v32, %v3313_v31  ;;  %v4038_v57 = vld [vmem:[#allocation8 + $0x14] sm:$0xf0]  ;;  %v3073_v58 = vld [vmem:[#allocation8 + $0x180] sm:$0xf]  ;;  %v4125_v12 = vld [vmem:[#allocation8 + $0x2d4] sm:$0xf] }
  0x51   : > { %v2882_v59 = vor.u32 %v4038_v57, %v2881_v56  ;;  %v4086_v60 = vld [vmem:[#allocation8 + $0x194] sm:$0xf0]  ;;  %v3265_v61 = vld [vmem:[#allocation8 + $0x300] sm:$0xf]  ;;  %v3243_v14 = vld [vmem:[#allocation8 + $0x2e8] sm:$0xf0] }
  0x52   : > { %v4134_v62 = vld [vmem:[#allocation8 + $0x314] sm:$0xf0]  ;;  %v3793_v15 = vld [vmem:[#allocation8 + $0x720] sm:$0xf]  ;;  %v3027_v23 = vld [vmem:[#allocation8 + $0x138] sm:$0xf0] }
  0x53   : > { %v4266_v16 = vld [vmem:[#allocation8 + $0x734] sm:$0xf0]  ;;  %v3985_v19 = vld [vmem:[#allocation8 + $0x8a0] sm:$0xf]  ;;  %v4119_v24 = vld [vmem:[#allocation8 + $0x2a4] sm:$0xf] }
  0x54   : > { %v3794_v18 = vor.u32 %v4266_v16, %v3793_v15  ;;  %v4314_v20 = vld [vmem:[#allocation8 + $0x8b4] sm:$0xf0]  ;;  %v3769_v28 = vld [vmem:[#allocation8 + $0x6f0] sm:$0xf]  ;;  %v4308_v32 = vld [vmem:[#allocation8 + $0x884] sm:$0xf0] }
  0x55   : > { %v3961_v30 = vld [vmem:[#allocation8 + $0x870] sm:$0xf]  ;;  %v4107_v56 = vld [vmem:[#allocation8 + $0x244] sm:$0xf]  ;;  %v3171_v57 = vld [vmem:[#allocation8 + $0x258] sm:$0xf0] }
  0x56   : > { %v3123_v15 = vld [vmem:[#allocation8 + $0x1f8] sm:$0xf0]  ;;  %s2724_s8 = sshll.u32 %s2720_s30, 4  ;;  %s4596_s1 = scalar_lea.hbm %s5066_s6, 96  ;;  %s2725_s8 = int_to_ptr.hbm [resolvable:$true] %s2724_s8 }
  0x57   : > { %s4590_s12 = sshra.s32 %s2725_s8, 4  ;;  %s4591_s12 = int_to_ptr.hbm [resolvable:$true] %s4590_s12 }
  0x58   : > { %s4592_s20 = scalar_lea.hbm %s4591_s12, 48  ;;  %p4597_p12 = scmp.lt.s32.totalorder %s4591_s12, %s5066_s6 }
  0x59   : > { %p4593_p1 = scmp.ne.s32.totalorder %s4591_s12, %s4592_s20  ;;  %p4598_p7 = scmp.lt.s32.totalorder %s4596_s1, %s4592_s20 }
  0x5b   : > { %p4594_p3 = pnand %p4593_p1, %p4808_p5  ;;  %p4599_p8 = por %p4598_p7, %p4597_p12 }
  0x5d   : > { %p4595_p4 = pneg %p4594_p3 }
  0x5f   : > { %p4600_p9 = pnand %p4599_p8, %p4595_p4 }
  0xbd   : > { %v353_v35 = vpop.xlane.xlu0 %352 }
  0xbe   : > { %v354_v36 = vmul.f32 0.0013020834, %v353_v35  ;;  %v3505_v35 = vld [vmem:[#allocation8 + $0x4e0] sm:$0xf] }
  0xc0   : > { %v4864_v37 = vsub.f32 %v341_v0, %v354_v36  ;;  %v4866_v38 = vsub.f32 %v342_v1, %v354_v36  ;;  %v4868_v39 = vsub.f32 %v343_v2, %v354_v36  ;;  %v4870_v40 = vsub.f32 %v344_v4, %v354_v36  ;;  %v4212_v0 = vld [vmem:[#allocation8 + $0x584] sm:$0xf0]  ;;  %v2977_v2 = vld [vmem:[#allocation8 + $0xc0] sm:$0xf] }
  0xc1   : > { %v4876_v43 = vsub.f32 %v345_v6, %v354_v36  ;;  %v4880_v46 = vsub.f32 %v346_v8, %v354_v36  ;;  %v3578_v1 = vor.u32 %v4212_v0, %v3577_v63  ;;  %v3169_v4 = vld [vmem:[#allocation8 + $0x240] sm:$0xf]  ;;  %v2978_v5 = vor.u32 %v4062_v3, %v2977_v2  ;;  %v4110_v6 = vld [vmem:[#allocation8 + $0x254] sm:$0xf0]  ;;  %v3817_v3 = vld [vmem:[#allocation8 + $0x750] sm:$0xf] }
  0xc2   : > { %v361_v41 = vmul.f32 %v4864_v37, %v4864_v37  ;;  %v362_v42 = vmul.f32 %v4866_v38, %v4866_v38  ;;  %v363_v44 = vmul.f32 %v4868_v39, %v4868_v39  ;;  %v364_v47 = vmul.f32 %v4870_v40, %v4870_v40  ;;  %v4158_v8 = vld [vmem:[#allocation8 + $0x3d4] sm:$0xf0] }
  0xc3   : > { %v365_v49 = vmul.f32 %v4876_v43, %v4876_v43  ;;  %v366_v51 = vmul.f32 %v4880_v46, %v4880_v46  ;;  %2243 = vmatpush.bf16.msra.mxu3 %v3578_v1  ;;  %v3170_v9 = vor.u32 %v4110_v6, %v3169_v4  ;;  %v3362_v10 = vor.u32 %v4158_v8, %v3361_v7  ;;  %v4194_v36 = vld [vmem:[#allocation8 + $0x4f4] sm:$0xf0]  ;;  %v3457_v1 = vld [vmem:[#allocation8 + $0x480] sm:$0xf]  ;;  %v4009_v6 = vld [vmem:[#allocation8 + $0x8d0] sm:$0xf] }
  0xc4   : > { %v367_v45 = vadd.f32 %v362_v42, %v361_v41  ;;  %2205 = vmatpush.bf16.msra.mxu0 %v2978_v5  ;;  %v3506_v41 = vor.u32 %v4194_v36, %v3505_v35  ;;  %v2905_v42 = vld [vmem:[#allocation8 + $0x30] sm:$0xf]  ;;  %v3074_v63 = vor.u32 %v4086_v60, %v3073_v58  ;;  %v3266_v0 = vor.u32 %v4134_v62, %v3265_v61  ;;  %v4182_v2 = vld [vmem:[#allocation8 + $0x494] sm:$0xf0]  ;;  %v4272_v5 = vld [vmem:[#allocation8 + $0x764] sm:$0xf0] }
  0xc5   : > { %2218 = vmatpush.bf16.msra.mxu1 %v3170_v9  ;;  %2231 = vmatpush.bf16.msra.mxu2 %v3362_v10  ;;  %v3458_v4 = vor.u32 %v4182_v2, %v3457_v1  ;;  %v4320_v7 = vld [vmem:[#allocation8 + $0x8e4] sm:$0xf0]  ;;  %v3818_v8 = vor.u32 %v4272_v5, %v3817_v3  ;;  %v4077_v10 = vld [vmem:[#allocation8 + $0x154] sm:$0xf]  ;;  %v3962_v35 = vor.u32 %v4308_v32, %v3961_v30  ;;  %v3721_v58 = vld [vmem:[#allocation8 + $0x690] sm:$0xf] }
  0xc6   : > { %v368_v48 = vadd.f32 %v367_v45, %v363_v44  ;;  %v4044_v44 = vld [vmem:[#allocation8 + $0x44] sm:$0xf0]  ;;  %v3097_v45 = vld [vmem:[#allocation8 + $0x1b0] sm:$0xf]  ;;  %v4010_v9 = vor.u32 %v4320_v7, %v4009_v6  ;;  %v3174_v60 = vor.u32 %v4107_v56, %v3171_v57  ;;  %v4053_v2 = vld [vmem:[#allocation8 + $0x94] sm:$0xf] }
  0xc7   : > { %2244 = vmatpush.bf16.msra.mxu3 %v3554_v13  ;;  %v3054_v13 = vor.u32 %v4077_v10, %v3051_v11  ;;  %v4248_v61 = vld [vmem:[#allocation8 + $0x6a4] sm:$0xf0]  ;;  %v3913_v62 = vld [vmem:[#allocation8 + $0x810] sm:$0xf]  ;;  %v2955_v3 = vld [vmem:[#allocation8 + $0xa8] sm:$0xf0] }
  0xc8   : > { %v369_v50 = vadd.f32 %v368_v48, %v364_v47  ;;  %2206 = vmatpush.bf16.msra.mxu0 %v2954_v17  ;;  %v2906_v47 = vor.u32 %v4044_v44, %v2905_v42  ;;  %v4092_v48 = vld [vmem:[#allocation8 + $0x1c4] sm:$0xf0]  ;;  %v3246_v17 = vor.u32 %v4125_v12, %v3243_v14  ;;  %v3195_v42 = vld [vmem:[#allocation8 + $0x288] sm:$0xf0]  ;;  %v2958_v5 = vor.u32 %v4053_v2, %v2955_v3  ;;  %v3697_v7 = vld [vmem:[#allocation8 + $0x660] sm:$0xf] }
  0xc9   : > { %2219 = vmatpush.bf16.msra.mxu1 %v3146_v21  ;;  %2232 = vmatpush.bf16.msra.mxu2 %v3338_v22  ;;  %v4071_v21 = vld [vmem:[#allocation8 + $0x124] sm:$0xf]  ;;  %v3986_v22 = vor.u32 %v4314_v20, %v3985_v19  ;;  %v3147_v6 = vld [vmem:[#allocation8 + $0x228] sm:$0xf0]  ;;  %v3889_v10 = vld [vmem:[#allocation8 + $0x7e0] sm:$0xf] }
  0xca   : > { %v370_v52 = vadd.f32 %v369_v50, %v365_v49  ;;  %v3289_v49 = vld [vmem:[#allocation8 + $0x330] sm:$0xf]  ;;  %v4140_v50 = vld [vmem:[#allocation8 + $0x344] sm:$0xf0]  ;;  %v3030_v26 = vor.u32 %v4071_v21, %v3027_v23  ;;  %v4290_v11 = vld [vmem:[#allocation8 + $0x7f4] sm:$0xf0] }
  0xcb   : > { %2245 = vmatpush.bf16.msra.mxu3 %v3530_v25  ;;  %v3219_v25 = vld [vmem:[#allocation8 + $0x2b8] sm:$0xf0]  ;;  %v4047_v12 = vld [vmem:[#allocation8 + $0x64] sm:$0xf]  ;;  %v3673_v19 = vld [vmem:[#allocation8 + $0x630] sm:$0xf] }
  0xcc   : > { %v371_v53 = vadd.f32 %v370_v52, %v366_v51  ;;  %2207 = vmatpush.bf16.msra.mxu0 %v2930_v29  ;;  %v3098_v51 = vor.u32 %v4092_v48, %v3097_v45  ;;  %v3290_v52 = vor.u32 %v4140_v50, %v3289_v49  ;;  %v3222_v27 = vor.u32 %v4119_v24, %v3219_v25  ;;  %v4260_v29 = vld [vmem:[#allocation8 + $0x704] sm:$0xf0]  ;;  %v4254_v48 = vld [vmem:[#allocation8 + $0x6d4] sm:$0xf0]  ;;  %v3937_v49 = vld [vmem:[#allocation8 + $0x840] sm:$0xf] }
  0xcd   : > { %2220 = vmatpush.bf16.msra.mxu1 %v3122_v33  ;;  %2233 = vmatpush.bf16.msra.mxu2 %v3314_v34  ;;  %v3770_v31 = vor.u32 %v4260_v29, %v3769_v28  ;;  %v4065_v33 = vld [vmem:[#allocation8 + $0xf4] sm:$0xf]  ;;  %v3003_v34 = vld [vmem:[#allocation8 + $0x108] sm:$0xf0]  ;;  %v4095_v14 = vld [vmem:[#allocation8 + $0x1e4] sm:$0xf] }
  0xce   : > { %372 = vadd.xlane.f32.xlu0 %v371_v53  ;;  %v3481_v53 = vld [vmem:[#allocation8 + $0x4b0] sm:$0xf]  ;;  %v3006_v36 = vor.u32 %v4065_v33, %v3003_v34  ;;  %v4284_v24 = vld [vmem:[#allocation8 + $0x7c4] sm:$0xf0]  ;;  %v3126_v25 = vor.u32 %v4095_v14, %v3123_v15  ;;  %v4089_v29 = vld [vmem:[#allocation8 + $0x1b4] sm:$0xf] }
  0xcf   : > { %2246 = vmatpush.bf16.msra.mxu3 %v3506_v41  ;;  %v3482_v55 = vor.u32 %v4188_v54, %v3481_v53  ;;  %v4113_v41 = vld [vmem:[#allocation8 + $0x274] sm:$0xf]  ;;  %v4059_v53 = vld [vmem:[#allocation8 + $0xc4] sm:$0xf]  ;;  %v3865_v23 = vld [vmem:[#allocation8 + $0x7b0] sm:$0xf] }
  0xd0   : > { %2208 = vmatpush.bf16.msra.mxu0 %v2906_v47  ;;  %v3198_v44 = vor.u32 %v4113_v41, %v3195_v42  ;;  %v3745_v47 = vld [vmem:[#allocation8 + $0x6c0] sm:$0xf]  ;;  %v3099_v30 = vld [vmem:[#allocation8 + $0x1c8] sm:$0xf0]  ;;  %v3866_v32 = vor.u32 %v4284_v24, %v3865_v23  ;;  %v4230_v34 = vld [vmem:[#allocation8 + $0x614] sm:$0xf0] }
  0xd1   : > { %2221 = vmatpush.bf16.msra.mxu1 %v3098_v51  ;;  %2234 = vmatpush.bf16.msra.mxu2 %v3290_v52  ;;  %v3746_v51 = vor.u32 %v4254_v48, %v3745_v47  ;;  %v4302_v52 = vld [vmem:[#allocation8 + $0x854] sm:$0xf0]  ;;  %v3649_v33 = vld [vmem:[#allocation8 + $0x600] sm:$0xf]  ;;  %v2883_v47 = vld [vmem:[#allocation8 + $0x18] sm:$0xf0] }
  0xd2   : > { %v3938_v54 = vor.u32 %v4302_v52, %v3937_v49  ;;  %v3841_v41 = vld [vmem:[#allocation8 + $0x780] sm:$0xf]  ;;  %v4278_v42 = vld [vmem:[#allocation8 + $0x794] sm:$0xf0]  ;;  %v4083_v49 = vld [vmem:[#allocation8 + $0x184] sm:$0xf]  ;;  %v3650_v52 = vor.u32 %v4230_v34, %v3649_v33 }
  0xd3   : > { %2247 = vmatpush.bf16.msra.mxu3 %v3482_v55  ;;  %v2979_v55 = vld [vmem:[#allocation8 + $0xd8] sm:$0xf0]  ;;  %v4173_v23 = vld [vmem:[#allocation8 + $0x454] sm:$0xf] }
  0xd4   : > { %2209 = vmatpush.bf16.msra.mxu0 %v2882_v59  ;;  %v2982_v59 = vor.u32 %v4059_v53, %v2979_v55  ;;  %v3842_v53 = vor.u32 %v4278_v42, %v3841_v41  ;;  %v3819_v41 = vld [vmem:[#allocation8 + $0x768] sm:$0xf0]  ;;  %v4317_v42 = vld [vmem:[#allocation8 + $0x8d4] sm:$0xf] }
  0xd5   : > { %2222 = vmatpush.bf16.msra.mxu1 %v3074_v63  ;;  %2235 = vmatpush.bf16.msra.mxu2 %v3266_v0  ;;  %v4296_v63 = vld [vmem:[#allocation8 + $0x824] sm:$0xf0]  ;;  %v3722_v0 = vor.u32 %v4248_v61, %v3721_v58 }
  0xd6   : > { %v3914_v1 = vor.u32 %v4296_v63, %v3913_v62 }
  0xd7   : > { %2248 = vmatpush.bf16.msra.mxu3 %v3458_v4  ;;  %v4101_v4 = vld [vmem:[#allocation8 + $0x214] sm:$0xf] }
  0xd8   : > { %2254 = vmatpush.bf16.msrb.mxu0 %v3818_v8  ;;  %v4242_v8 = vld [vmem:[#allocation8 + $0x674] sm:$0xf0] }
  0xd9   : > { %2267 = vmatpush.bf16.msrb.mxu1 %v4010_v9  ;;  %2280 = vmatpush.bf16.msrb.mxu2 %v3054_v13  ;;  %v3150_v9 = vor.u32 %v4101_v4, %v3147_v6  ;;  %v2931_v13 = vld [vmem:[#allocation8 + $0x78] sm:$0xf0] }
  0xda   : > { %v2934_v21 = vor.u32 %v4047_v12, %v2931_v13 }
  0xdb   : > { %2293 = vmatpush.bf16.msrb.mxu3 %v3246_v17  ;;  %v3698_v17 = vor.u32 %v4242_v8, %v3697_v7 }
  0xdc   : > { %2255 = vmatpush.bf16.msrb.mxu0 %v3794_v18  ;;  %v3890_v18 = vor.u32 %v4290_v11, %v3889_v10 }
  0xdd   : > { %2268 = vmatpush.bf16.msrb.mxu1 %v3986_v22  ;;  %2281 = vmatpush.bf16.msrb.mxu2 %v3030_v26  ;;  %v4236_v22 = vld [vmem:[#allocation8 + $0x644] sm:$0xf0]  ;;  %v4041_v26 = vld [vmem:[#allocation8 + $0x34] sm:$0xf] }
  0xdf   : > { %2294 = vmatpush.bf16.msrb.mxu3 %v3222_v27  ;;  %v2907_v27 = vld [vmem:[#allocation8 + $0x48] sm:$0xf0] }
  0xe0   : > { %2256 = vmatpush.bf16.msrb.mxu0 %v3770_v31  ;;  %v3674_v31 = vor.u32 %v4236_v22, %v3673_v19 }
  0xe1   : > { %2269 = vmatpush.bf16.msrb.mxu1 %v3962_v35  ;;  %2282 = vmatpush.bf16.msrb.mxu2 %v3006_v36  ;;  %v2910_v36 = vor.u32 %v4041_v26, %v2907_v27 }
  0xe3   : > { %2295 = vmatpush.bf16.msrb.mxu3 %v3198_v44  ;;  %v3102_v44 = vor.u32 %v4089_v29, %v3099_v30 }
  0xe4   : > { %2257 = vmatpush.bf16.msrb.mxu0 %v3746_v51  ;;  %v3075_v51 = vld [vmem:[#allocation8 + $0x198] sm:$0xf0] }
  0xe5   : > { %2270 = vmatpush.bf16.msrb.mxu1 %v3938_v54  ;;  %2283 = vmatpush.bf16.msrb.mxu2 %v2982_v59  ;;  %v3078_v56 = vor.u32 %v4083_v49, %v3075_v51 }
  0xe7   : > { %2296 = vmatpush.bf16.msrb.mxu3 %v3174_v60 }
  0xe8   : > { %2258 = vmatpush.bf16.msrb.mxu0 %v3722_v0 }
  0xe9   : > { %2271 = vmatpush.bf16.msrb.mxu1 %v3914_v1  ;;  %2284 = vmatpush.bf16.msrb.mxu2 %v2958_v5  ;;  %v387_v1 = vld [vmem:[#allocation5] sm:$0x3f]  ;;  %v4897_v5 = vld [vmem:[#allocation7] sm:$0x3f] }
  0xea   : > { %v410_v7 = vperm.slane %v387_v1, 0  ;;  %v411_v8 = vperm.slane %v387_v1, 1  ;;  %v431_v10 = vperm.slane %v4897_v5, 1  ;;  %v412_v11 = vperm.slane %v387_v1, 2 }
  0xeb   : > { %2297 = vmatpush.bf16.msrb.mxu3 %v3150_v9  ;;  %v430_v9 = vperm.slane %v4897_v5, 0  ;;  %v432_v13 = vperm.slane %v4897_v5, 2  ;;  %v413_v14 = vperm.slane %v387_v1, 3 }
  0xec   : > { %2259 = vmatpush.bf16.msrb.mxu0 %v3698_v17  ;;  %v414_v17 = vperm.slane %v387_v1, 4 }
  0xed   : > { %2272 = vmatpush.bf16.msrb.mxu1 %v3890_v18  ;;  %2285 = vmatpush.bf16.msrb.mxu2 %v2934_v21  ;;  %v415_v18 = vperm.slane %v387_v1, 5 }
  0xef   : > { %2298 = vmatpush.bf16.msrb.mxu3 %v3126_v25  ;;  %v434_v25 = vperm.slane %v4897_v5, 4 }
  0xf0   : > { %2260 = vmatpush.bf16.msrb.mxu0 %v3674_v31  ;;  %v3435_v31 = vld [vmem:[#allocation8 + $0x468] sm:$0xf0] }
  0xf1   : > { %2273 = vmatpush.bf16.msrb.mxu1 %v3866_v32  ;;  %2286 = vmatpush.bf16.msrb.mxu2 %v2910_v36  ;;  %v4221_v32 = vld [vmem:[#allocation8 + $0x5d4] sm:$0xf] }
  0xf3   : > { %2299 = vmatpush.bf16.msrb.mxu3 %v3102_v44  ;;  %v3438_v44 = vor.u32 %v4173_v23, %v3435_v31  ;;  %v4245_v31 = vld [vmem:[#allocation8 + $0x694] sm:$0xf] }
  0xf4   : > { %2261 = vmatpush.bf16.msrb.mxu0 %v3650_v52 }
  0xf5   : > { %2274 = vmatpush.bf16.msrb.mxu1 %v3842_v53 }
  0xf7   : > { %2300 = vmatpush.bf16.msrb.mxu3 %v3078_v56  ;;  %v3603_v56 = vld [vmem:[#allocation8 + $0x5b8] sm:$0xf0] }
 0x141   : > { %v373_v45 = vpop.xlane.xlu0 %372 }
 0x142   : > { %v4888_v50 = vmul.f32 0.0013037809, %v373_v45  ;;  %v4035_v45 = vld [vmem:[#allocation8 + $0x4] sm:$0xf] }
 0x143   : > { %v2886_v55 = vor.u32 %v4035_v45, %v2883_v47  ;;  %v4167_v47 = vld [vmem:[#allocation8 + $0x424] sm:$0xf] }
 0x144   : > { %4422 = vrsqrt.f32 %v4888_v50  ;;  %vm382_vm0 = vcmp.eq.f32.partialorder %v4888_v50, inf  ;;  %v385_v58 = vand.u32 2147483648, %v4888_v50  ;;  %vm384_vm1 = vcmp.eq.f32.partialorder %v4888_v50, 0.0 }
 0x145   : > { %2287 = vmatpush.bf16.msrb.mxu2 %v2886_v55  ;;  %v4215_v55 = vld [vmem:[#allocation8 + $0x5a4] sm:$0xf] }
 0x14a   : > { %v4423_v16 = vpop.eup %4422 }
 0x14b   : > { %v376_v20 = vmul.f32 %v4423_v16, %v4888_v50 }
 0x14d   : > { %v377_v28 = vmul.f32 %v4423_v16, %v376_v20 }
 0x14f   : > { %v378_v35 = vmul.f32 0.5, %v377_v28 }
 0x151   : > { %v379_v48 = vsub.f32 1.5, %v378_v35 }
 0x153   : > { %v380_v54 = vmul.f32 %v4423_v16, %v379_v48  ;;  %v433_v16 = vperm.slane %v4897_v5, 3 }
 0x155   : > { %v381_v57 = vmul.f32 %v380_v54, %v4888_v50  ;;  %v3411_v54 = vld [vmem:[#allocation8 + $0x438] sm:$0xf0] }
 0x156   : > { %v3414_v1 = vor.u32 %v4167_v47, %v3411_v54  ;;  %v4287_v47 = vld [vmem:[#allocation8 + $0x7e4] sm:$0xf] }
 0x157   : > { %v383_v59 = vsel %vm382_vm0, %v4888_v50, %v381_v57 }
 0x158   : > { %v386_v60 = vsel %vm384_vm1, %v385_v58, %v383_v59  ;;  %v4263_v59 = vld [vmem:[#allocation8 + $0x724] sm:$0xf] }
 0x159   : > { %v388_v61 = vadd.f32 1e-06, %v386_v60  ;;  %v3795_v60 = vld [vmem:[#allocation8 + $0x738] sm:$0xf0] }
 0x15b   : > { %4424 = vrcp.f32 %v388_v61  ;;  %v400_v2 = vand.u32 2147483648, %v388_v61  ;;  %v398_v4 = vand.u32 2147483647, %v388_v61  ;;  %vm394_vm3 = vweird.f32 %v388_v61 }
 0x15d   : > { %v401_v50 = vor.u32 1.1754944e-38, %v400_v2  ;;  %vm399_vm5 = vcmp.eq.f32.partialorder %v398_v4, 8.507059e+37  ;;  %v3606_v2 = vor.u32 %v4215_v55, %v3603_v56  ;;  %v4209_v4 = vld [vmem:[#allocation8 + $0x574] sm:$0xf] }
 0x15e   : > { %v4137_v56 = vld [vmem:[#allocation8 + $0x334] sm:$0xf] }
 0x161   : > { %v4425_v62 = vpop.eup %4424 }
 0x162   : > { %v390_v63 = vmul.f32 %v4425_v62, %v388_v61  ;;  %vm395_vm2 = vweird.f32 %v4425_v62 }
 0x163   : > { %vm396_vm4 = vmor %vm394_vm3, %vm395_vm2 }
 0x164   : > { %v391_v0 = vsub.f32 1.0, %v390_v63  ;;  %v3987_v63 = vld [vmem:[#allocation8 + $0x8b8] sm:$0xf0] }
 0x166   : > { %v392_v3 = vmul.f32 %v4425_v62, %v391_v0  ;;  %v4161_v0 = vld [vmem:[#allocation8 + $0x3f4] sm:$0xf] }
 0x168   : > { %v393_v6 = vadd.f32 %v4425_v62, %v392_v3  ;;  %v3387_v3 = vld [vmem:[#allocation8 + $0x408] sm:$0xf0] }
 0x16a   : > { %v397_v12 = vsel %vm396_vm4, %v4425_v62, %v393_v6  ;;  %v4311_v62 = vld [vmem:[#allocation8 + $0x8a4] sm:$0xf] }
 0x16b   : > { %v402_v15 = vsel %vm399_vm5, %v401_v50, %v397_v12  ;;  %v3990_v6 = vor.u32 %v4311_v62, %v3987_v63  ;;  %v3771_v50 = vld [vmem:[#allocation8 + $0x708] sm:$0xf0]  ;;  %v4233_v62 = vld [vmem:[#allocation8 + $0x634] sm:$0xf] }
 0x16c   : > { %v403_v19 = vmul.f32 %v402_v15, %v4864_v37  ;;  %v404_v20 = vmul.f32 %v402_v15, %v4866_v38  ;;  %v405_v21 = vmul.f32 %v402_v15, %v4868_v39  ;;  %v406_v22 = vmul.f32 %v402_v15, %v4870_v40  ;;  %v3627_v37 = vld [vmem:[#allocation8 + $0x5e8] sm:$0xf0]  ;;  %v4269_v38 = vld [vmem:[#allocation8 + $0x754] sm:$0xf] }
 0x16d   : > { %v407_v24 = vmul.f32 %v402_v15, %v4876_v43  ;;  %v408_v26 = vmul.f32 %v402_v15, %v4880_v46  ;;  %v435_v40 = vperm.slane %v4897_v5, 5  ;;  %v4011_v46 = vld [vmem:[#allocation8 + $0x8e8] sm:$0xf0]  ;;  %v3630_v45 = vor.u32 %v4221_v32, %v3627_v37  ;;  %v4293_v37 = vld [vmem:[#allocation8 + $0x814] sm:$0xf] }
 0x16e   : > { %v422_v27 = vmul.f32 %v410_v7, %v403_v19  ;;  %v423_v28 = vmul.f32 %v411_v8, %v404_v20  ;;  %v424_v29 = vmul.f32 %v412_v11, %v405_v21  ;;  %v425_v30 = vmul.f32 %v413_v14, %v406_v22  ;;  %v3579_v7 = vld [vmem:[#allocation8 + $0x588] sm:$0xf0]  ;;  %v4257_v8 = vld [vmem:[#allocation8 + $0x6f4] sm:$0xf]  ;;  %v3363_v14 = vld [vmem:[#allocation8 + $0x3d8] sm:$0xf0] }
 0x16f   : > { %v426_v33 = vmul.f32 %v414_v17, %v407_v24  ;;  %v427_v39 = vmul.f32 %v415_v18, %v408_v26  ;;  %v3822_v57 = vor.u32 %v4269_v38, %v3819_v41  ;;  %v4014_v58 = vor.u32 %v4317_v42, %v4011_v46  ;;  %v4203_v17 = vld [vmem:[#allocation8 + $0x544] sm:$0xf]  ;;  %v3555_v18 = vld [vmem:[#allocation8 + $0x558] sm:$0xf0]  ;;  %v3339_v26 = vld [vmem:[#allocation8 + $0x3a8] sm:$0xf0] }
 0x170   : > { %v442_v34 = vadd.f32 %v430_v9, %v422_v27  ;;  %v443_v35 = vadd.f32 %v431_v10, %v423_v28  ;;  %v444_v43 = vadd.f32 %v432_v13, %v424_v29  ;;  %v445_v36 = vadd.f32 %v433_v16, %v425_v30  ;;  %v4305_v9 = vld [vmem:[#allocation8 + $0x874] sm:$0xf]  ;;  %v3963_v10 = vld [vmem:[#allocation8 + $0x888] sm:$0xf0]  ;;  %v4155_v13 = vld [vmem:[#allocation8 + $0x3c4] sm:$0xf] }
 0x171   : > { %v4911_v48 = vadd.f32 %v434_v25, %v426_v33  ;;  %v4926_v61 = vadd.f32 %v435_v40, %v427_v39  ;;  %v3798_v5 = vor.u32 %v4263_v59, %v3795_v60  ;;  %v3390_v11 = vor.u32 %v4161_v0, %v3387_v3  ;;  %v4251_v19 = vld [vmem:[#allocation8 + $0x6c4] sm:$0xf]  ;;  %v3747_v20 = vld [vmem:[#allocation8 + $0x6d8] sm:$0xf0]  ;;  %v4149_v25 = vld [vmem:[#allocation8 + $0x394] sm:$0xf] }
 0x172   : > { %448 = vst [vmem:[%s4914_s29] sm:$0xff] %v442_v34  ;;  %v4917_v49 = vpack.c.bf16 %v442_v34, %v442_v34  ;;  %v4919_v51 = vpack.c.bf16 %v443_v35, %v443_v35  ;;  %v4921_v52 = vpack.c.bf16 %v444_v43, %v444_v43  ;;  %v4923_v53 = vpack.c.bf16 %v445_v36, %v445_v36  ;;  %v4299_v21 = vld [vmem:[#allocation8 + $0x844] sm:$0xf]  ;;  %v3939_v22 = vld [vmem:[#allocation8 + $0x858] sm:$0xf0]  ;;  %v4197_v29 = vld [vmem:[#allocation8 + $0x514] sm:$0xf] }
 0x173   : > { %449 = vst [vmem:[%s4914_s29 + $0x8] sm:$0xff] %v443_v35  ;;  %v3582_v12 = vor.u32 %v4209_v4, %v3579_v7  ;;  %v3774_v15 = vor.u32 %v4257_v8, %v3771_v50  ;;  %v3966_v16 = vor.u32 %v4305_v9, %v3963_v10  ;;  %v3366_v23 = vor.u32 %v4155_v13, %v3363_v14  ;;  %v3531_v30 = vld [vmem:[#allocation8 + $0x528] sm:$0xf0]  ;;  %v4143_v35 = vld [vmem:[#allocation8 + $0x364] sm:$0xf] }
 0x174   : > { %2210 = vmatmul.bf16.vlgmr.msra.gmra.mxu0 %v4917_v49  ;;  %2223 = vmatmul.bf16.vlgmr.msra.gmra.mxu1 %v4919_v51  ;;  %450 = vst [vmem:[%s4914_s29 + $0x10] sm:$0xff] %v444_v43  ;;  %v3558_v24 = vor.u32 %v4203_v17, %v3555_v18  ;;  %v3750_v27 = vor.u32 %v4251_v19, %v3747_v20  ;;  %v3723_v32 = vld [vmem:[#allocation8 + $0x6a8] sm:$0xf0]  ;;  %v3315_v43 = vld [vmem:[#allocation8 + $0x378] sm:$0xf0] }
 0x175   : > { %2236 = vmatmul.bf16.vlgmr.msra.gmra.mxu2 %v4921_v52  ;;  %451 = vst [vmem:[%s4914_s29 + $0x18] sm:$0xff] %v445_v36  ;;  %2249 = vmatmul.bf16.vlgmr.msra.gmra.mxu3 %v4923_v53  ;;  %v3942_v28 = vor.u32 %v4299_v21, %v3939_v22  ;;  %v3915_v38 = vld [vmem:[#allocation8 + $0x828] sm:$0xf0]  ;;  %v3342_v33 = vor.u32 %v4149_v25, %v3339_v26  ;;  %v4191_v42 = vld [vmem:[#allocation8 + $0x4e4] sm:$0xf] }
 0x176   : > { %2306 = vmatpush.bf16.msra.mxu0 %v3438_v44  ;;  %2319 = vmatpush.bf16.msra.mxu1 %v3630_v45  ;;  %452 = vst [vmem:[%s4914_s29 + $0x20] sm:$0xff] %v4911_v48  ;;  %v4940_v39 = vpack.c.bf16 %v4911_v48, %v4911_v48  ;;  %v4944_v40 = vpack.c.bf16 %v4926_v61, %v4926_v61  ;;  %v3507_v46 = vld [vmem:[#allocation8 + $0x4f8] sm:$0xf0]  ;;  %v4239_v44 = vld [vmem:[#allocation8 + $0x664] sm:$0xf] }
 0x177   : > { %2332 = vmatpush.bf16.msra.mxu2 %v3822_v57  ;;  %2345 = vmatpush.bf16.msra.mxu3 %v4014_v58  ;;  %453 = vst [vmem:[%s4914_s29 + $0x28] sm:$0xff] %v4926_v61  ;;  %v3534_v34 = vor.u32 %v4197_v29, %v3531_v30  ;;  %v3726_v36 = vor.u32 %v4245_v31, %v3723_v32  ;;  %v3699_v45 = vld [vmem:[#allocation8 + $0x678] sm:$0xf0]  ;;  %v3291_v57 = vld [vmem:[#allocation8 + $0x348] sm:$0xf0] }
 0x178   : > { %v3918_v41 = vor.u32 %v4293_v37, %v3915_v38  ;;  %v3891_v48 = vld [vmem:[#allocation8 + $0x7f8] sm:$0xf0]  ;;  %v3318_v54 = vor.u32 %v4143_v35, %v3315_v43  ;;  %v3510_v55 = vor.u32 %v4191_v42, %v3507_v46  ;;  %v3702_v58 = vor.u32 %v4239_v44, %v3699_v45  ;;  %v4185_v60 = vld [vmem:[#allocation8 + $0x4b4] sm:$0xf]  ;;  %v3483_v61 = vld [vmem:[#allocation8 + $0x4c8] sm:$0xf0] }
 0x179   : > { %v3894_v59 = vor.u32 %v4287_v47, %v3891_v48  ;;  %v3675_v63 = vld [vmem:[#allocation8 + $0x648] sm:$0xf0]  ;;  %v4281_v0 = vld [vmem:[#allocation8 + $0x7b4] sm:$0xf]  ;;  %v3294_v3 = vor.u32 %v4137_v56, %v3291_v57  ;;  %v3486_v4 = vor.u32 %v4185_v60, %v3483_v61  ;;  %v3459_v7 = vld [vmem:[#allocation8 + $0x498] sm:$0xf0] }
 0x17a   : > { %2307 = vmatpush.bf16.msra.mxu0 %v3414_v1  ;;  %2320 = vmatpush.bf16.msra.mxu1 %v3606_v2  ;;  %v3867_v1 = vld [vmem:[#allocation8 + $0x7c8] sm:$0xf0]  ;;  %v4131_v2 = vld [vmem:[#allocation8 + $0x304] sm:$0xf]  ;;  %v3678_v8 = vor.u32 %v4233_v62, %v3675_v63  ;;  %v3651_v10 = vld [vmem:[#allocation8 + $0x618] sm:$0xf0] }
 0x17b   : > { %2333 = vmatpush.bf16.msra.mxu2 %v3798_v5  ;;  %2346 = vmatpush.bf16.msra.mxu3 %v3990_v6  ;;  %v3267_v5 = vld [vmem:[#allocation8 + $0x318] sm:$0xf0]  ;;  %v4179_v6 = vld [vmem:[#allocation8 + $0x484] sm:$0xf]  ;;  %v3870_v50 = vor.u32 %v4281_v0, %v3867_v1  ;;  %v3057_v13 = vld [vmem:[#allocation8 + $0x158] sm:$0xf] }
 0x17c   : > { %v4227_v9 = vld [vmem:[#allocation8 + $0x604] sm:$0xf]  ;;  %v4081_v14 = vld [vmem:[#allocation8 + $0x16c] sm:$0xf0]  ;;  %v3441_v17 = vld [vmem:[#allocation8 + $0x458] sm:$0xf]  ;;  %v3270_v18 = vor.u32 %v4131_v2, %v3267_v5  ;;  %v3462_v19 = vor.u32 %v4179_v6, %v3459_v7 }
 0x17d   : > { %v4177_v20 = vld [vmem:[#allocation8 + $0x46c] sm:$0xf0]  ;;  %v3633_v21 = vld [vmem:[#allocation8 + $0x5d8] sm:$0xf]  ;;  %v3058_v25 = vor.u32 %v4081_v14, %v3057_v13  ;;  %v3225_v31 = vld [vmem:[#allocation8 + $0x2a8] sm:$0xf] }
 0x17e   : > { %2308 = vmatpush.bf16.msra.mxu0 %v3390_v11  ;;  %2321 = vmatpush.bf16.msra.mxu1 %v3582_v12  ;;  %v4275_v11 = vld [vmem:[#allocation8 + $0x784] sm:$0xf]  ;;  %v3843_v12 = vld [vmem:[#allocation8 + $0x798] sm:$0xf0]  ;;  %v4225_v22 = vld [vmem:[#allocation8 + $0x5ec] sm:$0xf0]  ;;  %v3442_v29 = vor.u32 %v4177_v20, %v3441_v17 }
 0x17f   : > { %2334 = vmatpush.bf16.msra.mxu2 %v3774_v15  ;;  %2347 = vmatpush.bf16.msra.mxu3 %v3966_v16  ;;  %v3249_v15 = vld [vmem:[#allocation8 + $0x2d8] sm:$0xf]  ;;  %v4129_v16 = vld [vmem:[#allocation8 + $0x2ec] sm:$0xf0]  ;;  %v3634_v30 = vor.u32 %v4225_v22, %v3633_v21  ;;  %v4123_v32 = vld [vmem:[#allocation8 + $0x2bc] sm:$0xf0] }
 0x180   : > { %v3250_v26 = vor.u32 %v4129_v16, %v3249_v15  ;;  %v3417_v37 = vld [vmem:[#allocation8 + $0x428] sm:$0xf]  ;;  %v4171_v38 = vld [vmem:[#allocation8 + $0x43c] sm:$0xf0]  ;;  %v3226_v43 = vor.u32 %v4123_v32, %v3225_v31  ;;  %v3201_v44 = vld [vmem:[#allocation8 + $0x278] sm:$0xf] }
 0x181   : > { %v3418_v42 = vor.u32 %v4171_v38, %v3417_v37  ;;  %v4117_v45 = vld [vmem:[#allocation8 + $0x28c] sm:$0xf0]  ;;  %v3393_v47 = vld [vmem:[#allocation8 + $0x3f8] sm:$0xf]  ;;  %v3177_v62 = vld [vmem:[#allocation8 + $0x248] sm:$0xf] }
 0x182   : > { %2309 = vmatpush.bf16.msra.mxu0 %v3366_v23  ;;  %2322 = vmatpush.bf16.msra.mxu1 %v3558_v24  ;;  %v3654_v23 = vor.u32 %v4227_v9, %v3651_v10  ;;  %v3846_v24 = vor.u32 %v4275_v11, %v3843_v12  ;;  %v4165_v48 = vld [vmem:[#allocation8 + $0x40c] sm:$0xf0]  ;;  %v3202_v57 = vor.u32 %v4117_v45, %v3201_v44  ;;  %v4111_v63 = vld [vmem:[#allocation8 + $0x25c] sm:$0xf0]  ;;  %v3369_v0 = vld [vmem:[#allocation8 + $0x3c8] sm:$0xf] }
 0x183   : > { %2335 = vmatpush.bf16.msra.mxu2 %v3750_v27  ;;  %2348 = vmatpush.bf16.msra.mxu3 %v3942_v28  ;;  %v3033_v27 = vld [vmem:[#allocation8 + $0x128] sm:$0xf]  ;;  %v4075_v28 = vld [vmem:[#allocation8 + $0x13c] sm:$0xf0]  ;;  %v3394_v60 = vor.u32 %v4165_v48, %v3393_v47  ;;  %v3178_v5 = vor.u32 %v4111_v63, %v3177_v62  ;;  %v2961_v6 = vld [vmem:[#allocation8 + $0x98] sm:$0xf] }
 0x184   : > { %2262 = vmatmul.bf16.vlgmr.msrb.gmra.mxu0 %v4940_v39  ;;  %2275 = vmatmul.bf16.vlgmr.msrb.gmra.mxu1 %v4944_v40  ;;  %v3034_v35 = vor.u32 %v4075_v28, %v3033_v27  ;;  %v4159_v1 = vld [vmem:[#allocation8 + $0x3dc] sm:$0xf0]  ;;  %v3561_v2 = vld [vmem:[#allocation8 + $0x548] sm:$0xf]  ;;  %v4057_v7 = vld [vmem:[#allocation8 + $0xac] sm:$0xf0] }
 0x185   : > { %2288 = vmatmul.bf16.vlgmr.msrb.gmra.mxu2 %v4917_v49  ;;  %2301 = vmatmul.bf16.vlgmr.msrb.gmra.mxu3 %v4919_v51  ;;  %v3153_v9 = vld [vmem:[#allocation8 + $0x218] sm:$0xf]  ;;  %v4105_v10 = vld [vmem:[#allocation8 + $0x22c] sm:$0xf0]  ;;  %v2962_v15 = vor.u32 %v4057_v7, %v2961_v6  ;;  %v2937_v17 = vld [vmem:[#allocation8 + $0x68] sm:$0xf] }
 0x186   : > { %2310 = vmatpush.bf16.msra.mxu0 %v3342_v33  ;;  %2323 = vmatpush.bf16.msra.mxu1 %v3534_v34  ;;  %v3609_v33 = vld [vmem:[#allocation8 + $0x5a8] sm:$0xf]  ;;  %v4219_v34 = vld [vmem:[#allocation8 + $0x5bc] sm:$0xf0]  ;;  %v3345_v11 = vld [vmem:[#allocation8 + $0x398] sm:$0xf]  ;;  %v3154_v16 = vor.u32 %v4105_v10, %v3153_v9 }
 0x187   : > { %2336 = vmatpush.bf16.msra.mxu2 %v3726_v36  ;;  %2349 = vmatpush.bf16.msra.mxu3 %v3918_v41  ;;  %v3009_v36 = vld [vmem:[#allocation8 + $0xf8] sm:$0xf]  ;;  %v4069_v41 = vld [vmem:[#allocation8 + $0x10c] sm:$0xf0]  ;;  %v3610_v46 = vor.u32 %v4219_v34, %v3609_v33  ;;  %v3129_v21 = vld [vmem:[#allocation8 + $0x1e8] sm:$0xf] }
 0x188   : > { %v3010_v56 = vor.u32 %v4069_v41, %v3009_v36  ;;  %v4153_v12 = vld [vmem:[#allocation8 + $0x3ac] sm:$0xf0]  ;;  %v3537_v13 = vld [vmem:[#allocation8 + $0x518] sm:$0xf]  ;;  %v4099_v22 = vld [vmem:[#allocation8 + $0x1fc] sm:$0xf0] }
 0x189   : > { %v4201_v14 = vld [vmem:[#allocation8 + $0x52c] sm:$0xf0]  ;;  %v3130_v28 = vor.u32 %v4099_v22, %v3129_v21  ;;  %v3105_v37 = vld [vmem:[#allocation8 + $0x1b8] sm:$0xf]  ;;  %v2889_v36 = vld [vmem:[#allocation8 + $0x8] sm:$0xf] }
 0x18a   : > { %2311 = vmatpush.bf16.msra.mxu0 %v3318_v54  ;;  %2324 = vmatpush.bf16.msra.mxu1 %v3510_v55  ;;  %v3585_v54 = vld [vmem:[#allocation8 + $0x578] sm:$0xf]  ;;  %v4213_v55 = vld [vmem:[#allocation8 + $0x58c] sm:$0xf0]  ;;  %v3538_v20 = vor.u32 %v4201_v14, %v3537_v13  ;;  %v3081_v44 = vld [vmem:[#allocation8 + $0x188] sm:$0xf] }
 0x18b   : > { %2337 = vmatpush.bf16.msra.mxu2 %v3702_v58  ;;  %2350 = vmatpush.bf16.msra.mxu3 %v3894_v59  ;;  %v2985_v58 = vld [vmem:[#allocation8 + $0xc8] sm:$0xf]  ;;  %v4063_v59 = vld [vmem:[#allocation8 + $0xdc] sm:$0xf0]  ;;  %v3586_v61 = vor.u32 %v4213_v55, %v3585_v54  ;;  %v4093_v38 = vld [vmem:[#allocation8 + $0x1cc] sm:$0xf0] }
 0x18c   : > { %v3297_v33 = vld [vmem:[#allocation8 + $0x338] sm:$0xf]  ;;  %v4141_v34 = vld [vmem:[#allocation8 + $0x34c] sm:$0xf0]  ;;  %v4087_v45 = vld [vmem:[#allocation8 + $0x19c] sm:$0xf0] }
 0x18d   : > { %v3298_v47 = vor.u32 %v4141_v34, %v3297_v33  ;;  %v3273_v54 = vld [vmem:[#allocation8 + $0x308] sm:$0xf]  ;;  %v4135_v55 = vld [vmem:[#allocation8 + $0x31c] sm:$0xf0]  ;;  %v4078_v62 = vld [vmem:[#allocation8 + $0x15c] sm:$0xf] }
 0x18e   : > { %2312 = vmatpush.bf16.msra.mxu0 %v3294_v3  ;;  %2325 = vmatpush.bf16.msra.mxu1 %v3486_v4  ;;  %v4207_v3 = vld [vmem:[#allocation8 + $0x55c] sm:$0xf0]  ;;  %v2986_v4 = vor.u32 %v4063_v59, %v2985_v58  ;;  %v3825_v58 = vld [vmem:[#allocation8 + $0x758] sm:$0xf]  ;;  %v4273_v59 = vld [vmem:[#allocation8 + $0x76c] sm:$0xf0] }
 0x18f   : > { %2338 = vmatpush.bf16.msra.mxu2 %v3678_v8  ;;  %2351 = vmatpush.bf16.msra.mxu3 %v3870_v50  ;;  %v3370_v8 = vor.u32 %v4159_v1, %v3369_v0  ;;  %v3562_v50 = vor.u32 %v4207_v3, %v3561_v2  ;;  %v3082_v0 = vor.u32 %v4087_v45, %v3081_v44  ;;  %v3059_v1 = vld [vmem:[#allocation8 + $0x170] sm:$0xf0]  ;;  %v4126_v2 = vld [vmem:[#allocation8 + $0x2dc] sm:$0xf]  ;;  %v4072_v13 = vld [vmem:[#allocation8 + $0x12c] sm:$0xf] }
 0x190   : > { %v3251_v3 = vld [vmem:[#allocation8 + $0x2f0] sm:$0xf0]  ;;  %v3826_v6 = vor.u32 %v4273_v59, %v3825_v58  ;;  %v3062_v9 = vor.u32 %v4078_v62, %v3059_v1  ;;  %v3035_v14 = vld [vmem:[#allocation8 + $0x140] sm:$0xf0]  ;;  %v3945_v33 = vld [vmem:[#allocation8 + $0x848] sm:$0xf] }
 0x191   : > { %v3254_v10 = vor.u32 %v4126_v2, %v3251_v3  ;;  %v3038_v21 = vor.u32 %v4072_v13, %v3035_v14  ;;  %v4303_v34 = vld [vmem:[#allocation8 + $0x85c] sm:$0xf0]  ;;  %v3729_v44 = vld [vmem:[#allocation8 + $0x698] sm:$0xf]  ;;  %v4249_v45 = vld [vmem:[#allocation8 + $0x6ac] sm:$0xf0] }
 0x192   : > { %2313 = vmatpush.bf16.msra.mxu0 %v3270_v18  ;;  %2326 = vmatpush.bf16.msra.mxu1 %v3462_v19  ;;  %v4051_v18 = vld [vmem:[#allocation8 + $0x7c] sm:$0xf0]  ;;  %v3346_v19 = vor.u32 %v4153_v12, %v3345_v11  ;;  %v3993_v11 = vld [vmem:[#allocation8 + $0x8a8] sm:$0xf]  ;;  %v4102_v58 = vld [vmem:[#allocation8 + $0x21c] sm:$0xf] }
 0x193   : > { %2339 = vmatpush.bf16.msra.mxu2 %v3654_v23  ;;  %2352 = vmatpush.bf16.msra.mxu3 %v3846_v24  ;;  %v3321_v23 = vld [vmem:[#allocation8 + $0x368] sm:$0xf]  ;;  %v4147_v24 = vld [vmem:[#allocation8 + $0x37c] sm:$0xf0]  ;;  %v2938_v27 = vor.u32 %v4051_v18, %v2937_v17  ;;  %v3155_v59 = vld [vmem:[#allocation8 + $0x230] sm:$0xf0] }
 0x194   : > { %v3322_v31 = vor.u32 %v4147_v24, %v3321_v23  ;;  %v4315_v12 = vld [vmem:[#allocation8 + $0x8bc] sm:$0xf0]  ;;  %v3969_v23 = vld [vmem:[#allocation8 + $0x878] sm:$0xf]  ;;  %v4309_v24 = vld [vmem:[#allocation8 + $0x88c] sm:$0xf0]  ;;  %v3158_v1 = vor.u32 %v4102_v58, %v3155_v59 }
 0x195   : > { %2314 = vmatmul.bf16.vlgmr.msra.gmra.mxu0 %v4921_v52  ;;  %2327 = vmatmul.bf16.vlgmr.msra.gmra.mxu1 %v4923_v53  ;;  %v3994_v18 = vor.u32 %v4315_v12, %v3993_v11  ;;  %v3705_v62 = vld [vmem:[#allocation8 + $0x668] sm:$0xf]  ;;  %v4291_v3 = vld [vmem:[#allocation8 + $0x7fc] sm:$0xf0]  ;;  %v3873_v13 = vld [vmem:[#allocation8 + $0x7b8] sm:$0xf] }
 0x196   : > { %2358 = vmatpush.bf16.msrb.mxu0 %v3058_v25  ;;  %2371 = vmatpush.bf16.msrb.mxu1 %v3250_v26  ;;  %v3513_v25 = vld [vmem:[#allocation8 + $0x4e8] sm:$0xf]  ;;  %v4195_v26 = vld [vmem:[#allocation8 + $0x4fc] sm:$0xf0]  ;;  %v4285_v14 = vld [vmem:[#allocation8 + $0x7cc] sm:$0xf0] }
 0x197   : > { %2384 = vmatpush.bf16.msrb.mxu2 %v3442_v29  ;;  %2397 = vmatpush.bf16.msrb.mxu3 %v3634_v30  ;;  %v2913_v29 = vld [vmem:[#allocation8 + $0x38] sm:$0xf]  ;;  %v4045_v30 = vld [vmem:[#allocation8 + $0x4c] sm:$0xf0]  ;;  %v3514_v32 = vor.u32 %v4195_v26, %v3513_v25  ;;  %v4066_v25 = vld [vmem:[#allocation8 + $0xfc] sm:$0xf] }
 0x198   : > { %2340 = vmatmul.bf16.vlgmr.msra.gmra.mxu2 %v4940_v39  ;;  %2353 = vmatmul.bf16.vlgmr.msra.gmra.mxu3 %v4944_v40  ;;  %v2914_v41 = vor.u32 %v4045_v30, %v2913_v29  ;;  %v3011_v26 = vld [vmem:[#allocation8 + $0x110] sm:$0xf0]  ;;  %v3970_v30 = vor.u32 %v4309_v24, %v3969_v23  ;;  %v3897_v2 = vld [vmem:[#allocation8 + $0x7e8] sm:$0xf]  ;;  %v4279_v24 = vld [vmem:[#allocation8 + $0x79c] sm:$0xf0] }
 0x199   : > { %v3849_v23 = vld [vmem:[#allocation8 + $0x788] sm:$0xf]  ;;  %v4264_v58 = vld [vmem:[#allocation8 + $0x72c] sm:$0xf]  ;;  %v3803_v59 = vld [vmem:[#allocation8 + $0x740] sm:$0xf0] }
 0x19a   : > { %2359 = vmatpush.bf16.msrb.mxu0 %v3034_v35  ;;  %2372 = vmatpush.bf16.msrb.mxu1 %v3226_v43  ;;  %v3489_v35 = vld [vmem:[#allocation8 + $0x4b8] sm:$0xf]  ;;  %v4189_v43 = vld [vmem:[#allocation8 + $0x4cc] sm:$0xf0] }
 0x19b   : > { %2385 = vmatpush.bf16.msrb.mxu2 %v3418_v42  ;;  %2398 = vmatpush.bf16.msrb.mxu3 %v3610_v46  ;;  %v3106_v42 = vor.u32 %v4093_v38, %v3105_v37  ;;  %v4039_v46 = vld [vmem:[#allocation8 + $0x1c] sm:$0xf0]  ;;  %v3490_v48 = vor.u32 %v4189_v43, %v3489_v35  ;;  %v3014_v37 = vor.u32 %v4066_v25, %v3011_v26  ;;  %v4060_v35 = vld [vmem:[#allocation8 + $0xcc] sm:$0xf]  ;;  %v2987_v43 = vld [vmem:[#allocation8 + $0xe0] sm:$0xf0] }
 0x19c   : > { %v2890_v63 = vor.u32 %v4039_v46, %v2889_v36  ;;  %v4108_v36 = vld [vmem:[#allocation8 + $0x24c] sm:$0xf]  ;;  %v3946_v46 = vor.u32 %v4303_v34, %v3945_v33  ;;  %v4270_v33 = vld [vmem:[#allocation8 + $0x75c] sm:$0xf] }
 0x19e   : > { %2360 = vmatpush.bf16.msrb.mxu0 %v3010_v56  ;;  %2373 = vmatpush.bf16.msrb.mxu1 %v3202_v57  ;;  %v3465_v56 = vld [vmem:[#allocation8 + $0x488] sm:$0xf]  ;;  %v4183_v57 = vld [vmem:[#allocation8 + $0x49c] sm:$0xf0] }
 0x19f   : > { %2386 = vmatpush.bf16.msrb.mxu2 %v3394_v60  ;;  %2399 = vmatpush.bf16.msrb.mxu3 %v3586_v61  ;;  %v4017_v60 = vld [vmem:[#allocation8 + $0x8d8] sm:$0xf]  ;;  %v4321_v61 = vld [vmem:[#allocation8 + $0x8ec] sm:$0xf0] }
 0x1a0   : > { %v4018_v7 = vor.u32 %v4321_v61, %v4017_v60  ;;  %v3730_v60 = vor.u32 %v4249_v45, %v3729_v44 }
 0x1a2   : > { %2361 = vmatpush.bf16.msrb.mxu0 %v2986_v4  ;;  %2374 = vmatpush.bf16.msrb.mxu1 %v3178_v5  ;;  %v3274_v4 = vor.u32 %v4135_v55, %v3273_v54  ;;  %v3466_v5 = vor.u32 %v4183_v57, %v3465_v56  ;;  %v3921_v54 = vld [vmem:[#allocation8 + $0x818] sm:$0xf]  ;;  %v4297_v55 = vld [vmem:[#allocation8 + $0x82c] sm:$0xf0]  ;;  %v4054_v56 = vld [vmem:[#allocation8 + $0x9c] sm:$0xf] }
 0x1a3   : > { %2387 = vmatpush.bf16.msrb.mxu2 %v3370_v8  ;;  %2400 = vmatpush.bf16.msrb.mxu3 %v3562_v50  ;;  %v3801_v8 = vld [vmem:[#allocation8 + $0x728] sm:$0xf]  ;;  %v4267_v50 = vld [vmem:[#allocation8 + $0x73c] sm:$0xf0]  ;;  %v2963_v57 = vld [vmem:[#allocation8 + $0xb0] sm:$0xf0]  ;;  %v3922_v61 = vor.u32 %v4297_v55, %v3921_v54 }
 0x1a4   : > { %v3802_v17 = vor.u32 %v4267_v50, %v3801_v8  ;;  %v3898_v50 = vor.u32 %v4291_v3, %v3897_v2  ;;  %v3806_v2 = vor.u32 %v4264_v58, %v3803_v59  ;;  %v4186_v58 = vld [vmem:[#allocation8 + $0x4bc] sm:$0xf]  ;;  %v3491_v59 = vld [vmem:[#allocation8 + $0x4d0] sm:$0xf0] }
 0x1a6   : > { %2362 = vmatpush.bf16.msrb.mxu0 %v2962_v15  ;;  %2375 = vmatpush.bf16.msrb.mxu1 %v3154_v16  ;;  %v4120_v15 = vld [vmem:[#allocation8 + $0x2ac] sm:$0xf]  ;;  %v3227_v16 = vld [vmem:[#allocation8 + $0x2c0] sm:$0xf0] }
 0x1a7   : > { %2388 = vmatpush.bf16.msrb.mxu2 %v3346_v19  ;;  %2401 = vmatpush.bf16.msrb.mxu3 %v3538_v20  ;;  %v3777_v19 = vld [vmem:[#allocation8 + $0x6f8] sm:$0xf]  ;;  %v4261_v20 = vld [vmem:[#allocation8 + $0x70c] sm:$0xf0]  ;;  %v3230_v22 = vor.u32 %v4120_v15, %v3227_v16  ;;  %v4042_v15 = vld [vmem:[#allocation8 + $0x3c] sm:$0xf] }
 0x1a8   : > { %v3778_v29 = vor.u32 %v4261_v20, %v3777_v19  ;;  %v2915_v16 = vld [vmem:[#allocation8 + $0x50] sm:$0xf0]  ;;  %v3657_v19 = vld [vmem:[#allocation8 + $0x608] sm:$0xf] }
 0x1a9   : > { %v2918_v25 = vor.u32 %v4042_v15, %v2915_v16  ;;  %v4204_v15 = vld [vmem:[#allocation8 + $0x54c] sm:$0xf]  ;;  %v3563_v16 = vld [vmem:[#allocation8 + $0x560] sm:$0xf0] }
 0x1aa   : > { %2363 = vmatpush.bf16.msrb.mxu0 %v2938_v27  ;;  %2376 = vmatpush.bf16.msrb.mxu1 %v3130_v28  ;;  %v4114_v27 = vld [vmem:[#allocation8 + $0x27c] sm:$0xf]  ;;  %v3203_v28 = vld [vmem:[#allocation8 + $0x290] sm:$0xf0] }
 0x1ab   : > { %2389 = vmatpush.bf16.msrb.mxu2 %v3322_v31  ;;  %2402 = vmatpush.bf16.msrb.mxu3 %v3514_v32  ;;  %v3753_v31 = vld [vmem:[#allocation8 + $0x6c8] sm:$0xf]  ;;  %v4255_v32 = vld [vmem:[#allocation8 + $0x6dc] sm:$0xf0]  ;;  %v3206_v38 = vor.u32 %v4114_v27, %v3203_v28  ;;  %v4036_v27 = vld [vmem:[#allocation8 + $0xc] sm:$0xf] }
 0x1ac   : > { %v2891_v28 = vld [vmem:[#allocation8 + $0x20] sm:$0xf0] }
 0x1ae   : > { %2364 = vmatpush.bf16.msrb.mxu0 %v2914_v41  ;;  %2377 = vmatpush.bf16.msrb.mxu1 %v3106_v42  ;;  %v3179_v41 = vld [vmem:[#allocation8 + $0x260] sm:$0xf0]  ;;  %v3754_v42 = vor.u32 %v4255_v32, %v3753_v31  ;;  %v4174_v31 = vld [vmem:[#allocation8 + $0x45c] sm:$0xf]  ;;  %v3443_v32 = vld [vmem:[#allocation8 + $0x470] sm:$0xf0] }
 0x1af   : > { %2390 = vmatpush.bf16.msrb.mxu2 %v3298_v47  ;;  %2403 = vmatpush.bf16.msrb.mxu3 %v3490_v48  ;;  %v2990_v47 = vor.u32 %v4060_v35, %v2987_v43  ;;  %v3182_v48 = vor.u32 %v4108_v36, %v3179_v41  ;;  %v3850_v35 = vor.u32 %v4279_v24, %v3849_v23  ;;  %v3827_v43 = vld [vmem:[#allocation8 + $0x770] sm:$0xf0]  ;;  %v4318_v36 = vld [vmem:[#allocation8 + $0x8dc] sm:$0xf] }
 0x1b0   : > { %v4019_v41 = vld [vmem:[#allocation8 + $0x8f0] sm:$0xf0]  ;;  %v3446_v44 = vor.u32 %v4174_v31, %v3443_v32  ;;  %v3830_v54 = vor.u32 %v4270_v33, %v3827_v43  ;;  %v4150_v23 = vld [vmem:[#allocation8 + $0x39c] sm:$0xf]  ;;  %v4144_v33 = vld [vmem:[#allocation8 + $0x36c] sm:$0xf] }
 0x1b1   : > { %v4022_v55 = vor.u32 %v4318_v36, %v4019_v41  ;;  %v3347_v24 = vld [vmem:[#allocation8 + $0x3b0] sm:$0xf0]  ;;  %v4294_v31 = vld [vmem:[#allocation8 + $0x81c] sm:$0xf]  ;;  %v4192_v36 = vld [vmem:[#allocation8 + $0x4ec] sm:$0xf] }
 0x1b2   : > { %2365 = vmatpush.bf16.msrb.mxu0 %v2890_v63  ;;  %2378 = vmatpush.bf16.msrb.mxu1 %v3082_v0  ;;  %v4243_v63 = vld [vmem:[#allocation8 + $0x67c] sm:$0xf0]  ;;  %v2966_v0 = vor.u32 %v4054_v56, %v2963_v57  ;;  %v4216_v56 = vld [vmem:[#allocation8 + $0x5ac] sm:$0xf]  ;;  %v3611_v57 = vld [vmem:[#allocation8 + $0x5c0] sm:$0xf0] }
 0x1b3   : > { %2391 = vmatpush.bf16.msrb.mxu2 %v3274_v4  ;;  %2404 = vmatpush.bf16.msrb.mxu3 %v3466_v5  ;;  %v4048_v4 = vld [vmem:[#allocation8 + $0x6c] sm:$0xf]  ;;  %v2939_v5 = vld [vmem:[#allocation8 + $0x80] sm:$0xf0]  ;;  %v3706_v8 = vor.u32 %v4243_v63, %v3705_v62  ;;  %v3614_v63 = vor.u32 %v4216_v56, %v3611_v57  ;;  %v3923_v32 = vld [vmem:[#allocation8 + $0x830] sm:$0xf0] }
 0x1b4   : > { %v2942_v11 = vor.u32 %v4048_v4, %v2939_v5  ;;  %v4210_v4 = vld [vmem:[#allocation8 + $0x57c] sm:$0xf]  ;;  %v3587_v5 = vld [vmem:[#allocation8 + $0x590] sm:$0xf0]  ;;  %v3926_v43 = vor.u32 %v4294_v31, %v3923_v32  ;;  %v3515_v41 = vld [vmem:[#allocation8 + $0x500] sm:$0xf0] }
 0x1b5   : > { %2366 = vmatmul.bf16.vlgmr.msrb.gmra.mxu0 %v4917_v49  ;;  %2379 = vmatmul.bf16.vlgmr.msrb.gmra.mxu1 %v4919_v51  ;;  %v3425_v31 = vld [vmem:[#allocation8 + $0x430] sm:$0xf]  ;;  %v4172_v32 = vld [vmem:[#allocation8 + $0x444] sm:$0xf0] }
 0x1b6   : > { %2410 = vmatpush.bf16.msra.mxu0 %v3826_v6  ;;  %2423 = vmatpush.bf16.msra.mxu1 %v4018_v7  ;;  %v4096_v6 = vld [vmem:[#allocation8 + $0x1ec] sm:$0xf]  ;;  %v3131_v7 = vld [vmem:[#allocation8 + $0x200] sm:$0xf0] }
 0x1b7   : > { %2436 = vmatpush.bf16.msra.mxu2 %v3062_v9  ;;  %2449 = vmatpush.bf16.msra.mxu3 %v3254_v10  ;;  %v3681_v9 = vld [vmem:[#allocation8 + $0x638] sm:$0xf]  ;;  %v4237_v10 = vld [vmem:[#allocation8 + $0x64c] sm:$0xf0]  ;;  %v3134_v12 = vor.u32 %v4096_v6, %v3131_v7  ;;  %v4258_v6 = vld [vmem:[#allocation8 + $0x6fc] sm:$0xf] }
 0x1b8   : > { %2392 = vmatmul.bf16.vlgmr.msrb.gmra.mxu2 %v4921_v52  ;;  %2405 = vmatmul.bf16.vlgmr.msrb.gmra.mxu3 %v4923_v53  ;;  %v3682_v20 = vor.u32 %v4237_v10, %v3681_v9  ;;  %v3779_v7 = vld [vmem:[#allocation8 + $0x710] sm:$0xf0]  ;;  %v3590_v10 = vor.u32 %v4210_v4, %v3587_v5  ;;  %v4180_v4 = vld [vmem:[#allocation8 + $0x48c] sm:$0xf]  ;;  %v3467_v5 = vld [vmem:[#allocation8 + $0x4a0] sm:$0xf0] }
 0x1ba   : > { %2411 = vmatpush.bf16.msra.mxu0 %v3802_v17  ;;  %2424 = vmatpush.bf16.msra.mxu1 %v3994_v18  ;;  %v4090_v17 = vld [vmem:[#allocation8 + $0x1bc] sm:$0xf]  ;;  %v3107_v18 = vld [vmem:[#allocation8 + $0x1d0] sm:$0xf0] }
 0x1bb   : > { %2437 = vmatpush.bf16.msra.mxu2 %v3038_v21  ;;  %2450 = vmatpush.bf16.msra.mxu3 %v3230_v22  ;;  %v3874_v21 = vor.u32 %v4285_v14, %v3873_v13  ;;  %v4231_v22 = vld [vmem:[#allocation8 + $0x61c] sm:$0xf0]  ;;  %v3110_v26 = vor.u32 %v4090_v17, %v3107_v18  ;;  %v3782_v13 = vor.u32 %v4258_v6, %v3779_v7  ;;  %v4252_v17 = vld [vmem:[#allocation8 + $0x6cc] sm:$0xf]  ;;  %v3755_v18 = vld [vmem:[#allocation8 + $0x6e0] sm:$0xf0] }
 0x1bc   : > { %v3658_v34 = vor.u32 %v4231_v22, %v3657_v19  ;;  %v4300_v19 = vld [vmem:[#allocation8 + $0x84c] sm:$0xf]  ;;  %v3566_v22 = vor.u32 %v4204_v15, %v3563_v16  ;;  %v3449_v15 = vld [vmem:[#allocation8 + $0x460] sm:$0xf] }
 0x1be   : > { %2412 = vmatpush.bf16.msra.mxu0 %v3778_v29  ;;  %2425 = vmatpush.bf16.msra.mxu1 %v3970_v30  ;;  %v4084_v29 = vld [vmem:[#allocation8 + $0x18c] sm:$0xf]  ;;  %v3083_v30 = vld [vmem:[#allocation8 + $0x1a0] sm:$0xf0] }
 0x1bf   : > { %2438 = vmatpush.bf16.msra.mxu2 %v3014_v37  ;;  %2451 = vmatpush.bf16.msra.mxu3 %v3206_v38  ;;  %v4222_v37 = vld [vmem:[#allocation8 + $0x5dc] sm:$0xf]  ;;  %v3635_v38 = vld [vmem:[#allocation8 + $0x5f0] sm:$0xf0] }
 0x1c0   : > { %v3638_v45 = vor.u32 %v4222_v37, %v3635_v38  ;;  %v3350_v37 = vor.u32 %v4150_v23, %v3347_v24 }
 0x1c2   : > { %2413 = vmatpush.bf16.msra.mxu0 %v3754_v42  ;;  %2426 = vmatpush.bf16.msra.mxu1 %v3946_v46  ;;  %v2894_v42 = vor.u32 %v4036_v27, %v2891_v28  ;;  %v3086_v46 = vor.u32 %v4084_v29, %v3083_v30  ;;  %v4198_v27 = vld [vmem:[#allocation8 + $0x51c] sm:$0xf]  ;;  %v3539_v28 = vld [vmem:[#allocation8 + $0x530] sm:$0xf0] }
 0x1c3   : > { %2439 = vmatpush.bf16.msra.mxu2 %v2990_v47  ;;  %2452 = vmatpush.bf16.msra.mxu3 %v3182_v48  ;;  %v4168_v47 = vld [vmem:[#allocation8 + $0x42c] sm:$0xf]  ;;  %v3419_v48 = vld [vmem:[#allocation8 + $0x440] sm:$0xf0]  ;;  %v4246_v29 = vld [vmem:[#allocation8 + $0x69c] sm:$0xf]  ;;  %v3542_v38 = vor.u32 %v4198_v27, %v3539_v28 }
 0x1c4   : > { %v3422_v62 = vor.u32 %v4168_v47, %v3419_v48  ;;  %v3731_v30 = vld [vmem:[#allocation8 + $0x6b0] sm:$0xf0]  ;;  %v3518_v48 = vor.u32 %v4192_v36, %v3515_v41  ;;  %v3209_v36 = vld [vmem:[#allocation8 + $0x280] sm:$0xf]  ;;  %v3426_v41 = vor.u32 %v4172_v32, %v3425_v31  ;;  %v3329_v31 = vld [vmem:[#allocation8 + $0x370] sm:$0xf] }
 0x1c6   : > { %2414 = vmatpush.bf16.msra.mxu0 %v3730_v60  ;;  %2427 = vmatpush.bf16.msra.mxu1 %v3922_v61  ;;  %v4312_v60 = vld [vmem:[#allocation8 + $0x8ac] sm:$0xf]  ;;  %v3995_v61 = vld [vmem:[#allocation8 + $0x8c0] sm:$0xf0] }
 0x1c7   : > { %2440 = vmatpush.bf16.msra.mxu2 %v2966_v0  ;;  %2453 = vmatpush.bf16.msra.mxu3 %v3158_v1  ;;  %v4162_v0 = vld [vmem:[#allocation8 + $0x3fc] sm:$0xf]  ;;  %v3395_v1 = vld [vmem:[#allocation8 + $0x410] sm:$0xf0]  ;;  %v3998_v3 = vor.u32 %v4312_v60, %v3995_v61 }
 0x1c8   : > { %v3398_v9 = vor.u32 %v4162_v0, %v3395_v1  ;;  %v4234_v60 = vld [vmem:[#allocation8 + $0x63c] sm:$0xf]  ;;  %v3683_v61 = vld [vmem:[#allocation8 + $0x650] sm:$0xf0]  ;;  %v4132_v0 = vld [vmem:[#allocation8 + $0x30c] sm:$0xf] }
 0x1c9   : > { %v3686_v6 = vor.u32 %v4234_v60, %v3683_v61  ;;  %v2993_v60 = vld [vmem:[#allocation8 + $0xd0] sm:$0xf]  ;;  %v4064_v61 = vld [vmem:[#allocation8 + $0xe4] sm:$0xf0] }
 0x1ca   : > { %2415 = vmatpush.bf16.msra.mxu0 %v3706_v8  ;;  %2428 = vmatpush.bf16.msra.mxu1 %v3898_v50  ;;  %v4306_v8 = vld [vmem:[#allocation8 + $0x87c] sm:$0xf]  ;;  %v3971_v50 = vld [vmem:[#allocation8 + $0x890] sm:$0xf0] }
 0x1cb   : > { %2441 = vmatpush.bf16.msra.mxu2 %v2942_v11  ;;  %2454 = vmatpush.bf16.msra.mxu3 %v3134_v12  ;;  %v4156_v11 = vld [vmem:[#allocation8 + $0x3cc] sm:$0xf]  ;;  %v3371_v12 = vld [vmem:[#allocation8 + $0x3e0] sm:$0xf0]  ;;  %v3974_v14 = vor.u32 %v4306_v8, %v3971_v50 }
 0x1cc   : > { %v4228_v8 = vld [vmem:[#allocation8 + $0x60c] sm:$0xf]  ;;  %v3659_v50 = vld [vmem:[#allocation8 + $0x620] sm:$0xf0] }
 0x1ce   : > { %2416 = vmatpush.bf16.msra.mxu0 %v3682_v20  ;;  %2429 = vmatpush.bf16.msra.mxu1 %v3874_v21  ;;  %v3947_v20 = vld [vmem:[#allocation8 + $0x860] sm:$0xf0]  ;;  %v3374_v21 = vor.u32 %v4156_v11, %v3371_v12  ;;  %v3065_v11 = vld [vmem:[#allocation8 + $0x160] sm:$0xf]  ;;  %v4082_v12 = vld [vmem:[#allocation8 + $0x174] sm:$0xf0] }
 0x1cf   : > { %2442 = vmatpush.bf16.msra.mxu2 %v2918_v25  ;;  %2455 = vmatpush.bf16.msra.mxu3 %v3110_v26  ;;  %v3758_v25 = vor.u32 %v4252_v17, %v3755_v18  ;;  %v3950_v26 = vor.u32 %v4300_v19, %v3947_v20  ;;  %v3470_v17 = vor.u32 %v4180_v4, %v3467_v5  ;;  %v4178_v18 = vld [vmem:[#allocation8 + $0x474] sm:$0xf0]  ;;  %v3641_v19 = vld [vmem:[#allocation8 + $0x5e0] sm:$0xf]  ;;  %v3569_v4 = vld [vmem:[#allocation8 + $0x550] sm:$0xf] }
 0x1d0   : > { %v4226_v20 = vld [vmem:[#allocation8 + $0x5f4] sm:$0xf0]  ;;  %v3066_v23 = vor.u32 %v4082_v12, %v3065_v11  ;;  %v3450_v27 = vor.u32 %v4178_v18, %v3449_v15  ;;  %v4208_v5 = vld [vmem:[#allocation8 + $0x564] sm:$0xf0]  ;;  %v3161_v12 = vld [vmem:[#allocation8 + $0x220] sm:$0xf] }
 0x1d1   : > { %v3642_v28 = vor.u32 %v4226_v20, %v3641_v19  ;;  %v3570_v11 = vor.u32 %v4208_v5, %v3569_v4  ;;  %v3545_v18 = vld [vmem:[#allocation8 + $0x520] sm:$0xf]  ;;  %v4202_v19 = vld [vmem:[#allocation8 + $0x534] sm:$0xf0]  ;;  %v4088_v4 = vld [vmem:[#allocation8 + $0x1a4] sm:$0xf0] }
 0x1d2   : > { %2417 = vmatpush.bf16.msra.mxu0 %v3658_v34  ;;  %2430 = vmatpush.bf16.msra.mxu1 %v3850_v35  ;;  %v3323_v34 = vld [vmem:[#allocation8 + $0x380] sm:$0xf0]  ;;  %v3734_v35 = vor.u32 %v4246_v29, %v3731_v30  ;;  %v3233_v29 = vld [vmem:[#allocation8 + $0x2b0] sm:$0xf]  ;;  %v4124_v30 = vld [vmem:[#allocation8 + $0x2c4] sm:$0xf0] }
 0x1d3   : > { %2443 = vmatpush.bf16.msra.mxu2 %v2894_v42  ;;  %2456 = vmatpush.bf16.msra.mxu3 %v3086_v46  ;;  %v4240_v42 = vld [vmem:[#allocation8 + $0x66c] sm:$0xf]  ;;  %v3707_v46 = vld [vmem:[#allocation8 + $0x680] sm:$0xf0]  ;;  %v3326_v47 = vor.u32 %v4144_v33, %v3323_v34  ;;  %v3234_v34 = vor.u32 %v4124_v30, %v3233_v29  ;;  %v3137_v29 = vld [vmem:[#allocation8 + $0x1f0] sm:$0xf] }
 0x1d4   : > { %v3710_v56 = vor.u32 %v4240_v42, %v3707_v46  ;;  %v4118_v46 = vld [vmem:[#allocation8 + $0x294] sm:$0xf0]  ;;  %v4100_v30 = vld [vmem:[#allocation8 + $0x204] sm:$0xf0] }
 0x1d5   : > { %2418 = vmatmul.bf16.vlgmr.msra.gmra.mxu0 %v4940_v39  ;;  %2431 = vmatmul.bf16.vlgmr.msra.gmra.mxu1 %v4944_v40 }
 0x1d6   : > { %2462 = vmatpush.bf16.msrb.mxu0 %v3446_v44  ;;  %2475 = vmatpush.bf16.msrb.mxu1 %v3638_v45  ;;  %v4288_v44 = vld [vmem:[#allocation8 + $0x7ec] sm:$0xf]  ;;  %v3899_v45 = vld [vmem:[#allocation8 + $0x800] sm:$0xf0] }
 0x1d7   : > { %2488 = vmatpush.bf16.msrb.mxu2 %v3830_v54  ;;  %2501 = vmatpush.bf16.msrb.mxu3 %v4022_v55  ;;  %v4138_v54 = vld [vmem:[#allocation8 + $0x33c] sm:$0xf]  ;;  %v3299_v55 = vld [vmem:[#allocation8 + $0x350] sm:$0xf0]  ;;  %v3902_v57 = vor.u32 %v4288_v44, %v3899_v45  ;;  %v3401_v44 = vld [vmem:[#allocation8 + $0x400] sm:$0xf] }
 0x1d8   : > { %2444 = vmatmul.bf16.vlgmr.msra.gmra.mxu2 %v4917_v49  ;;  %2457 = vmatmul.bf16.vlgmr.msra.gmra.mxu3 %v4919_v51  ;;  %v3302_v1 = vor.u32 %v4138_v54, %v3299_v55  ;;  %v4962_v45 = vld [vmem:[#allocation10] sm:$0x3f]  ;;  %v4214_v54 = vld [vmem:[#allocation8 + $0x594] sm:$0xf0] }
 0x1da   : > { %2463 = vmatpush.bf16.msrb.mxu0 %v3422_v62  ;;  %2476 = vmatpush.bf16.msrb.mxu1 %v3614_v63  ;;  %v4282_v62 = vld [vmem:[#allocation8 + $0x7bc] sm:$0xf]  ;;  %v3875_v63 = vld [vmem:[#allocation8 + $0x7d0] sm:$0xf0] }
 0x1db   : > { %2489 = vmatpush.bf16.msrb.mxu2 %v3806_v2  ;;  %2502 = vmatpush.bf16.msrb.mxu3 %v3998_v3  ;;  %v3494_v2 = vor.u32 %v4186_v58, %v3491_v59  ;;  %v3275_v3 = vld [vmem:[#allocation8 + $0x320] sm:$0xf0]  ;;  %v3878_v7 = vor.u32 %v4282_v62, %v3875_v63  ;;  %v3210_v58 = vor.u32 %v4118_v46, %v3209_v36  ;;  %v750_v59 = vperm.slane %v4962_v45, 0  ;;  %v4046_v36 = vld [vmem:[#allocation8 + $0x54] sm:$0xf0] }
 0x1dc   : > { %v3278_v16 = vor.u32 %v4132_v0, %v3275_v3  ;;  %v3185_v0 = vld [vmem:[#allocation8 + $0x250] sm:$0xf]  ;;  %v4160_v3 = vld [vmem:[#allocation8 + $0x3e4] sm:$0xf0]  ;;  %v3113_v46 = vld [vmem:[#allocation8 + $0x1c0] sm:$0xf] }
 0x1de   : > { %2464 = vmatpush.bf16.msrb.mxu0 %v3398_v9  ;;  %2477 = vmatpush.bf16.msrb.mxu1 %v3590_v10  ;;  %v4276_v9 = vld [vmem:[#allocation8 + $0x78c] sm:$0xf]  ;;  %v3851_v10 = vld [vmem:[#allocation8 + $0x7a0] sm:$0xf0] }
 0x1df   : > { %2490 = vmatpush.bf16.msrb.mxu2 %v3782_v13  ;;  %2503 = vmatpush.bf16.msrb.mxu3 %v3974_v14  ;;  %v3257_v13 = vld [vmem:[#allocation8 + $0x2e0] sm:$0xf]  ;;  %v4130_v14 = vld [vmem:[#allocation8 + $0x2f4] sm:$0xf0] }
 0x1e0   : > { %v3258_v24 = vor.u32 %v4130_v14, %v3257_v13  ;;  %v4106_v13 = vld [vmem:[#allocation8 + $0x234] sm:$0xf0]  ;;  %v3353_v14 = vld [vmem:[#allocation8 + $0x3a0] sm:$0xf] }
 0x1e2   : > { %2465 = vmatpush.bf16.msrb.mxu0 %v3374_v21  ;;  %2478 = vmatpush.bf16.msrb.mxu1 %v3566_v22  ;;  %v3662_v21 = vor.u32 %v4228_v8, %v3659_v50  ;;  %v3854_v22 = vor.u32 %v4276_v9, %v3851_v10  ;;  %v2969_v50 = vld [vmem:[#allocation8 + $0xa0] sm:$0xf]  ;;  %v4058_v9 = vld [vmem:[#allocation8 + $0xb4] sm:$0xf0] }
 0x1e3   : > { %2491 = vmatpush.bf16.msrb.mxu2 %v3758_v25  ;;  %2504 = vmatpush.bf16.msrb.mxu3 %v3950_v26  ;;  %v3041_v25 = vld [vmem:[#allocation8 + $0x130] sm:$0xf]  ;;  %v4076_v26 = vld [vmem:[#allocation8 + $0x144] sm:$0xf0] }
 0x1e4   : > { %v3042_v33 = vor.u32 %v4076_v26, %v3041_v25  ;;  %v2945_v25 = vld [vmem:[#allocation8 + $0x70] sm:$0xf]  ;;  %v4052_v26 = vld [vmem:[#allocation8 + $0x84] sm:$0xf0] }
 0x1e6   : > { %2466 = vmatpush.bf16.msrb.mxu0 %v3350_v37  ;;  %2479 = vmatpush.bf16.msrb.mxu1 %v3542_v38  ;;  %v3617_v37 = vld [vmem:[#allocation8 + $0x5b0] sm:$0xf]  ;;  %v4220_v38 = vld [vmem:[#allocation8 + $0x5c4] sm:$0xf0] }
 0x1e7   : > { %2492 = vmatpush.bf16.msrb.mxu2 %v3734_v35  ;;  %2505 = vmatpush.bf16.msrb.mxu3 %v3926_v43  ;;  %v3017_v35 = vld [vmem:[#allocation8 + $0x100] sm:$0xf]  ;;  %v4070_v43 = vld [vmem:[#allocation8 + $0x114] sm:$0xf0]  ;;  %v3618_v42 = vor.u32 %v4220_v38, %v3617_v37  ;;  %v4148_v37 = vld [vmem:[#allocation8 + $0x384] sm:$0xf0] }
 0x1e8   : > { %v3521_v38 = vld [vmem:[#allocation8 + $0x4f0] sm:$0xf] }
 0x1ea   : > { %2467 = vmatpush.bf16.msrb.mxu0 %v3326_v47  ;;  %2480 = vmatpush.bf16.msrb.mxu1 %v3518_v48  ;;  %v4166_v47 = vld [vmem:[#allocation8 + $0x414] sm:$0xf0]  ;;  %v3593_v48 = vld [vmem:[#allocation8 + $0x580] sm:$0xf] }
 0x1eb   : > { %2493 = vmatpush.bf16.msrb.mxu2 %v3710_v56  ;;  %2506 = vmatpush.bf16.msrb.mxu3 %v3902_v57  ;;  %v3018_v57 = vor.u32 %v4070_v43, %v3017_v35  ;;  %v3402_v62 = vor.u32 %v4166_v47, %v3401_v44  ;;  %v3594_v63 = vor.u32 %v4214_v54, %v3593_v48  ;;  %v2921_v43 = vld [vmem:[#allocation8 + $0x40] sm:$0xf]  ;;  %v4094_v44 = vld [vmem:[#allocation8 + $0x1d4] sm:$0xf0] }
 0x1ec   : > { %v3138_v35 = vor.u32 %v4100_v30, %v3137_v29  ;;  %v3305_v47 = vld [vmem:[#allocation8 + $0x340] sm:$0xf]  ;;  %v4268_v29 = vld [vmem:[#allocation8 + $0x744] sm:$0xf0] }
 0x1ee   : > { %2468 = vmatpush.bf16.msrb.mxu0 %v3302_v1  ;;  %2481 = vmatpush.bf16.msrb.mxu1 %v3494_v2  ;;  %v4112_v1 = vld [vmem:[#allocation8 + $0x264] sm:$0xf0]  ;;  %v3377_v2 = vld [vmem:[#allocation8 + $0x3d0] sm:$0xf] }
 0x1ef   : > { %2494 = vmatpush.bf16.msrb.mxu2 %v3686_v6  ;;  %2507 = vmatpush.bf16.msrb.mxu3 %v3878_v7  ;;  %v2994_v7 = vor.u32 %v4064_v61, %v2993_v60  ;;  %v3186_v8 = vor.u32 %v4112_v1, %v3185_v0  ;;  %v3378_v10 = vor.u32 %v4160_v3, %v3377_v2  ;;  %v2670_v61 = vld [vmem:[%s4844_s17] sm:$0xff]  ;;  %v3089_v3 = vld [vmem:[#allocation8 + $0x190] sm:$0xf] }
 0x1f0   : > { %v3114_v0 = vor.u32 %v4094_v44, %v3113_v46  ;;  %v4040_v2 = vld [vmem:[#allocation8 + $0x24] sm:$0xf0]  ;;  %v3785_v44 = vld [vmem:[#allocation8 + $0x700] sm:$0xf] }
 0x1f1   : > { %v2211_v55 = vpop.f32.mrf.mxu0  ;;  %v2224_v56 = vpop.f32.mrf.mxu1 }
 0x1f2   : > { %2469 = vmatpush.bf16.msrb.mxu0 %v3278_v16  ;;  %2482 = vmatpush.bf16.msrb.mxu1 %v3470_v17  ;;  %v2212_v6 = vadd.f32 %v2211_v55, %v750_v59  ;;  %v4154_v17 = vld [vmem:[#allocation8 + $0x3b4] sm:$0xf0] }
 0x1f3   : > { %2495 = vmatpush.bf16.msrb.mxu2 %v3662_v21  ;;  %2508 = vmatpush.bf16.msrb.mxu3 %v3854_v22 }
 0x1f4   : > { %v2225_v22 = vadd.f32 %v2224_v56, %v2212_v6  ;;  %v4142_v56 = vld [vmem:[#allocation8 + $0x354] sm:$0xf0] }
 0x1f5   : > { %2470 = vmatmul.bf16.vlgmr.msrb.gmra.mxu0 %v4921_v52  ;;  %2483 = vmatmul.bf16.vlgmr.msrb.gmra.mxu1 %v4923_v53  ;;  %v3306_v5 = vor.u32 %v4142_v56, %v3305_v47  ;;  %v4262_v47 = vld [vmem:[#allocation8 + $0x714] sm:$0xf0] }
 0x1f6   : > { %2514 = vmatpush.bf16.msra.mxu0 %v3066_v23  ;;  %2527 = vmatpush.bf16.msra.mxu1 %v3258_v24  ;;  %v2970_v23 = vor.u32 %v4058_v9, %v2969_v50  ;;  %v3162_v24 = vor.u32 %v4106_v13, %v3161_v12  ;;  %v3473_v50 = vld [vmem:[#allocation8 + $0x490] sm:$0xf]  ;;  %v4274_v12 = vld [vmem:[#allocation8 + $0x774] sm:$0xf0]  ;;  %v4025_v13 = vld [vmem:[#allocation8 + $0x8e0] sm:$0xf] }
 0x1f7   : > { %2540 = vmatpush.bf16.msra.mxu2 %v3450_v27  ;;  %2553 = vmatpush.bf16.msra.mxu3 %v3642_v28  ;;  %v3354_v27 = vor.u32 %v4154_v17, %v3353_v14  ;;  %v3546_v28 = vor.u32 %v4202_v19, %v3545_v18  ;;  %v4322_v14 = vld [vmem:[#allocation8 + $0x8f4] sm:$0xf0]  ;;  %v3090_v18 = vor.u32 %v4088_v4, %v3089_v3  ;;  %v3067_v19 = vld [vmem:[#allocation8 + $0x178] sm:$0xf0]  ;;  %v4256_v3 = vld [vmem:[#allocation8 + $0x6e4] sm:$0xf0] }
 0x1f8   : > { %2496 = vmatmul.bf16.vlgmr.msrb.gmra.mxu2 %v4940_v39  ;;  %2509 = vmatmul.bf16.vlgmr.msrb.gmra.mxu3 %v4944_v40  ;;  %v2237_v15 = vpop.f32.mrf.mxu2  ;;  %v2250_v16 = vpop.f32.mrf.mxu3  ;;  %v4310_v56 = vld [vmem:[#allocation8 + $0x894] sm:$0xf0] }
 0x1f9   : > { %v2213_v20 = vpop.f32.mrf.mxu0  ;;  %v2226_v21 = vpop.f32.mrf.mxu1  ;;  %v2238_v32 = vadd.f32 %v2237_v15, %v2225_v22  ;;  %v4079_v15 = vld [vmem:[#allocation8 + $0x164] sm:$0xf] }
 0x1fa   : > { %2515 = vmatpush.bf16.msra.mxu0 %v3042_v33  ;;  %2528 = vmatpush.bf16.msra.mxu1 %v3234_v34  ;;  %v4196_v33 = vld [vmem:[#allocation8 + $0x504] sm:$0xf0]  ;;  %v2946_v34 = vor.u32 %v4052_v26, %v2945_v25  ;;  %v4127_v20 = vld [vmem:[#allocation8 + $0x2e4] sm:$0xf]  ;;  %v3259_v21 = vld [vmem:[#allocation8 + $0x2f8] sm:$0xf0]  ;;  %v4026_v25 = vor.u32 %v4322_v14, %v4025_v13  ;;  %v3070_v30 = vor.u32 %v4079_v15, %v3067_v19 }
 0x1fb   : > { %2541 = vmatpush.bf16.msra.mxu2 %v3426_v41  ;;  %2554 = vmatpush.bf16.msra.mxu3 %v3618_v42  ;;  %v3330_v41 = vor.u32 %v4148_v37, %v3329_v31  ;;  %v3522_v42 = vor.u32 %v4196_v33, %v3521_v38  ;;  %v2251_v48 = vadd.f32 %v2250_v16, %v2238_v32  ;;  %v4001_v38 = vld [vmem:[#allocation8 + $0x8b0] sm:$0xf]  ;;  %v4316_v33 = vld [vmem:[#allocation8 + $0x8c4] sm:$0xf0] }
 0x1fc   : > { %v3262_v31 = vor.u32 %v4127_v20, %v3259_v21  ;;  %v4002_v46 = vor.u32 %v4316_v33, %v4001_v38  ;;  %v3929_v21 = vld [vmem:[#allocation8 + $0x820] sm:$0xf]  ;;  %v3905_v38 = vld [vmem:[#allocation8 + $0x7f0] sm:$0xf]  ;;  %v4292_v33 = vld [vmem:[#allocation8 + $0x804] sm:$0xf0] }
 0x1fe   : > { %2516 = vmatpush.bf16.msra.mxu0 %v3018_v57  ;;  %2529 = vmatpush.bf16.msra.mxu1 %v3210_v58  ;;  %v3497_v57 = vld [vmem:[#allocation8 + $0x4c0] sm:$0xf]  ;;  %v4190_v58 = vld [vmem:[#allocation8 + $0x4d4] sm:$0xf0] }
 0x1ff   : > { %2542 = vmatpush.bf16.msra.mxu2 %v3402_v62  ;;  %2555 = vmatpush.bf16.msra.mxu3 %v3594_v63  ;;  %v2897_v62 = vld [vmem:[#allocation8 + $0x10] sm:$0xf]  ;;  %v2922_v63 = vor.u32 %v4046_v36, %v2921_v43  ;;  %v3498_v6 = vor.u32 %v4190_v58, %v3497_v57  ;;  %v4121_v43 = vld [vmem:[#allocation8 + $0x2b4] sm:$0xf]  ;;  %v3235_v36 = vld [vmem:[#allocation8 + $0x2c8] sm:$0xf0] }
 0x200   : > { %v2239_v54 = vpop.f32.mrf.mxu2  ;;  %v2252_v55 = vpop.f32.mrf.mxu3  ;;  %v2898_v17 = vor.u32 %v4040_v2, %v2897_v62  ;;  %v4067_v57 = vld [vmem:[#allocation8 + $0x104] sm:$0xf]  ;;  %v3019_v58 = vld [vmem:[#allocation8 + $0x118] sm:$0xf0]  ;;  %v3786_v62 = vor.u32 %v4262_v47, %v3785_v44  ;;  %v3761_v2 = vld [vmem:[#allocation8 + $0x6d0] sm:$0xf] }
 0x201   : > { %v2263_v59 = vpop.f32.mrf.mxu0  ;;  %v2276_v60 = vpop.f32.mrf.mxu1  ;;  %v3238_v54 = vor.u32 %v4121_v43, %v3235_v36  ;;  %v3977_v55 = vld [vmem:[#allocation8 + $0x880] sm:$0xf]  ;;  %v3022_v4 = vor.u32 %v4067_v57, %v3019_v58  ;;  %v3762_v14 = vor.u32 %v4256_v3, %v3761_v2  ;;  %v2947_v36 = vld [vmem:[#allocation8 + $0x88] sm:$0xf0]  ;;  %v4238_v57 = vld [vmem:[#allocation8 + $0x654] sm:$0xf0] }
 0x202   : > { %2517 = vmatpush.bf16.msra.mxu0 %v2994_v7  ;;  %2530 = vmatpush.bf16.msra.mxu1 %v3186_v8  ;;  %v2264_v1 = vadd.f32 %v2263_v59, %v2251_v48  ;;  %v3281_v7 = vld [vmem:[#allocation8 + $0x310] sm:$0xf]  ;;  %v4136_v8 = vld [vmem:[#allocation8 + $0x324] sm:$0xf0]  ;;  %v4115_v59 = vld [vmem:[#allocation8 + $0x284] sm:$0xf] }
 0x203   : > { %2543 = vmatpush.bf16.msra.mxu2 %v3378_v10  ;;  %2556 = vmatpush.bf16.msra.mxu3 %v3570_v11  ;;  %v4184_v10 = vld [vmem:[#allocation8 + $0x4a4] sm:$0xf0]  ;;  %v3833_v11 = vld [vmem:[#allocation8 + $0x760] sm:$0xf]  ;;  %v3282_v22 = vor.u32 %v4136_v8, %v3281_v7  ;;  %v4061_v8 = vld [vmem:[#allocation8 + $0xd4] sm:$0xf] }
 0x204   : > { %v2277_v9 = vadd.f32 %v2276_v60, %v2264_v1  ;;  %v3211_v60 = vld [vmem:[#allocation8 + $0x298] sm:$0xf0]  ;;  %v4304_v7 = vld [vmem:[#allocation8 + $0x864] sm:$0xf0] }
 0x205   : > { %v3115_v2 = vld [vmem:[#allocation8 + $0x1d8] sm:$0xf0] }
 0x206   : > { %2518 = vmatpush.bf16.msra.mxu0 %v2970_v23  ;;  %2531 = vmatpush.bf16.msra.mxu1 %v3162_v24  ;;  %v2676_v16 = vadd.f32 %v2670_v61, %v2277_v9  ;;  %v3474_v23 = vor.u32 %v4184_v10, %v3473_v50  ;;  %v3834_v24 = vor.u32 %v4274_v12, %v3833_v11  ;;  %v2995_v50 = vld [vmem:[#allocation8 + $0xe8] sm:$0xf0]  ;;  %v4109_v9 = vld [vmem:[#allocation8 + $0x254] sm:$0xf] }
 0x207   : > { %2544 = vmatpush.bf16.msra.mxu2 %v3354_v27  ;;  %2557 = vmatpush.bf16.msra.mxu3 %v3546_v28  ;;  %v3809_v28 = vld [vmem:[#allocation8 + $0x730] sm:$0xf]  ;;  %v3187_v10 = vld [vmem:[#allocation8 + $0x268] sm:$0xf0]  ;;  %v2998_v19 = vor.u32 %v4061_v8, %v2995_v50  ;;  %v4280_v50 = vld [vmem:[#allocation8 + $0x7a4] sm:$0xf0] }
 0x208   : > { %2682 = vst [vmem:[%s4971_s14] sm:$0xff] %v2676_v16  ;;  %v2289_v26 = vpop.f32.mrf.mxu2  ;;  %v2302_v27 = vpop.f32.mrf.mxu3  ;;  %v3737_v16 = vld [vmem:[#allocation8 + $0x6a0] sm:$0xf]  ;;  %v3190_v20 = vor.u32 %v4109_v9, %v3187_v10  ;;  %v3857_v8 = vld [vmem:[#allocation8 + $0x790] sm:$0xf]  ;;  %v4037_v9 = vld [vmem:[#allocation8 + $0x14] sm:$0xf] }
 0x209   : > { %v2265_v32 = vpop.f32.mrf.mxu0  ;;  %v2278_v37 = vpop.f32.mrf.mxu1 }
 0x20a   : > { %2519 = vmatpush.bf16.msra.mxu0 %v2946_v34  ;;  %2532 = vmatpush.bf16.msra.mxu1 %v3138_v35  ;;  %v4073_v34 = vld [vmem:[#allocation8 + $0x134] sm:$0xf]  ;;  %v3043_v35 = vld [vmem:[#allocation8 + $0x148] sm:$0xf0] }
 0x20b   : > { %2545 = vmatpush.bf16.msra.mxu2 %v3330_v41  ;;  %2558 = vmatpush.bf16.msra.mxu3 %v3522_v42  ;;  %v751_v41 = vperm.slane %v4962_v45, 1  ;;  %v3810_v42 = vor.u32 %v4268_v29, %v3809_v28  ;;  %v3046_v48 = vor.u32 %v4073_v34, %v3043_v35  ;;  %v3713_v29 = vld [vmem:[#allocation8 + $0x670] sm:$0xf]  ;;  %v4049_v34 = vld [vmem:[#allocation8 + $0x74] sm:$0xf] }
 0x20d   : > { %v2290_v61 = vadd.f32 %v2289_v26, %v751_v41  ;;  %v3163_v26 = vld [vmem:[#allocation8 + $0x238] sm:$0xf0]  ;;  %v4097_v41 = vld [vmem:[#allocation8 + $0x1f4] sm:$0xf] }
 0x20e   : > { %2520 = vmatpush.bf16.msra.mxu0 %v2922_v63  ;;  %2533 = vmatpush.bf16.msra.mxu1 %v3114_v0  ;;  %v3978_v63 = vor.u32 %v4310_v56, %v3977_v55  ;;  %v3906_v55 = vor.u32 %v4292_v33, %v3905_v38  ;;  %v3689_v56 = vld [vmem:[#allocation8 + $0x640] sm:$0xf]  ;;  %v4217_v33 = vld [vmem:[#allocation8 + $0x5b4] sm:$0xf] }
 0x20f   : > { %2546 = vmatpush.bf16.msra.mxu2 %v3306_v5  ;;  %2559 = vmatpush.bf16.msra.mxu3 %v3498_v6  ;;  %v3214_v5 = vor.u32 %v4115_v59, %v3211_v60  ;;  %v3953_v6 = vld [vmem:[#allocation8 + $0x850] sm:$0xf]  ;;  %v2303_v11 = vadd.f32 %v2302_v27, %v2290_v61  ;;  %v2950_v59 = vor.u32 %v4049_v34, %v2947_v36  ;;  %v3881_v61 = vld [vmem:[#allocation8 + $0x7c0] sm:$0xf]  ;;  %v3619_v34 = vld [vmem:[#allocation8 + $0x5c8] sm:$0xf0] }
 0x210   : > { %v2291_v0 = vpop.f32.mrf.mxu2  ;;  %v2304_v1 = vpop.f32.mrf.mxu3  ;;  %v3954_v15 = vor.u32 %v4304_v7, %v3953_v6  ;;  %v3690_v6 = vor.u32 %v4238_v57, %v3689_v56  ;;  %v4313_v36 = vld [vmem:[#allocation8 + $0x8b4] sm:$0xf]  ;;  %v3595_v56 = vld [vmem:[#allocation8 + $0x598] sm:$0xf0]  ;;  %v4259_v57 = vld [vmem:[#allocation8 + $0x704] sm:$0xf] }
 0x211   : > { %v2923_v0 = vld [vmem:[#allocation8 + $0x58] sm:$0xf0]  ;;  %v4091_v1 = vld [vmem:[#allocation8 + $0x1c4] sm:$0xf] }
 0x212   : > { %2521 = vmatpush.bf16.msra.mxu0 %v2898_v17  ;;  %2534 = vmatpush.bf16.msra.mxu1 %v3090_v18  ;;  %v2315_v12 = vpop.f32.mrf.mxu0  ;;  %v2328_v13 = vpop.f32.mrf.mxu1  ;;  %v4250_v17 = vld [vmem:[#allocation8 + $0x6b4] sm:$0xf0] }
 0x213   : > { %2547 = vmatpush.bf16.msra.mxu2 %v3282_v22  ;;  %2560 = vmatpush.bf16.msra.mxu3 %v3474_v23  ;;  %v2316_v18 = vadd.f32 %v2315_v12, %v2303_v11  ;;  %v4298_v22 = vld [vmem:[#allocation8 + $0x834] sm:$0xf0]  ;;  %v4055_v23 = vld [vmem:[#allocation8 + $0xa4] sm:$0xf]  ;;  %v3738_v27 = vor.u32 %v4250_v17, %v3737_v16  ;;  %v3118_v11 = vor.u32 %v4091_v1, %v3115_v2  ;;  %v2899_v12 = vld [vmem:[#allocation8 + $0x28] sm:$0xf0] }
 0x214   : > { %v3930_v28 = vor.u32 %v4298_v22, %v3929_v21  ;;  %v3091_v16 = vld [vmem:[#allocation8 + $0x1a8] sm:$0xf0]  ;;  %v4175_v17 = vld [vmem:[#allocation8 + $0x464] sm:$0xf] }
 0x215   : > { %2522 = vmatmul.bf16.vlgmr.msra.gmra.mxu0 %v4917_v49  ;;  %2535 = vmatmul.bf16.vlgmr.msra.gmra.mxu1 %v4919_v51  ;;  %v4271_v21 = vld [vmem:[#allocation8 + $0x764] sm:$0xf] }
 0x216   : > { %2566 = vmatpush.bf16.msrb.mxu0 %v3834_v24  ;;  %2579 = vmatpush.bf16.msrb.mxu1 %v4026_v25  ;;  %v2971_v24 = vld [vmem:[#allocation8 + $0xb8] sm:$0xf0]  ;;  %v4103_v25 = vld [vmem:[#allocation8 + $0x224] sm:$0xf] }
 0x217   : > { %2592 = vmatpush.bf16.msrb.mxu2 %v3070_v30  ;;  %2605 = vmatpush.bf16.msrb.mxu3 %v3262_v31  ;;  %v4244_v30 = vld [vmem:[#allocation8 + $0x684] sm:$0xf0]  ;;  %v2329_v31 = vadd.f32 %v2328_v13, %v2316_v18  ;;  %v2974_v32 = vor.u32 %v4055_v23, %v2971_v24  ;;  %v3166_v37 = vor.u32 %v4103_v25, %v3163_v26  ;;  %v4085_v13 = vld [vmem:[#allocation8 + $0x194] sm:$0xf]  ;;  %v3451_v18 = vld [vmem:[#allocation8 + $0x478] sm:$0xf0] }
 0x218   : > { %2548 = vmatmul.bf16.vlgmr.msra.gmra.mxu2 %v4921_v52  ;;  %2561 = vmatmul.bf16.vlgmr.msra.gmra.mxu3 %v4923_v53  ;;  %v3858_v23 = vor.u32 %v4280_v50, %v3857_v8  ;;  %v3835_v24 = vld [vmem:[#allocation8 + $0x778] sm:$0xf0]  ;;  %v4319_v25 = vld [vmem:[#allocation8 + $0x8e4] sm:$0xf]  ;;  %v3955_v8 = vld [vmem:[#allocation8 + $0x868] sm:$0xf0] }
 0x219   : > { %v4027_v26 = vld [vmem:[#allocation8 + $0x8f8] sm:$0xf0] }
 0x21a   : > { %2567 = vmatpush.bf16.msrb.mxu0 %v3810_v42  ;;  %2580 = vmatpush.bf16.msrb.mxu1 %v4002_v46  ;;  %v3139_v42 = vld [vmem:[#allocation8 + $0x208] sm:$0xf0]  ;;  %v2317_v44 = vpop.f32.mrf.mxu0  ;;  %v2330_v47 = vpop.f32.mrf.mxu1  ;;  %v4030_v38 = vor.u32 %v4319_v25, %v4027_v26  ;;  %v4193_v26 = vld [vmem:[#allocation8 + $0x4f4] sm:$0xf] }
 0x21b   : > { %2593 = vmatpush.bf16.msrb.mxu2 %v3046_v48  ;;  %2606 = vmatpush.bf16.msrb.mxu3 %v3238_v54  ;;  %v2341_v35 = vpop.f32.mrf.mxu2  ;;  %v2354_v43 = vpop.f32.mrf.mxu3  ;;  %v2671_v48 = vld [vmem:[%s4844_s17 + $0x8] sm:$0xff]  ;;  %v3714_v54 = vor.u32 %v4244_v30, %v3713_v29  ;;  %v3142_v60 = vor.u32 %v4097_v41, %v3139_v42  ;;  %v3454_v29 = vor.u32 %v4175_v17, %v3451_v18  ;;  %v4163_v44 = vld [vmem:[#allocation8 + $0x404] sm:$0xf] }
 0x21c   : > { %v2342_v46 = vadd.f32 %v2341_v35, %v2329_v31  ;;  %v4169_v31 = vld [vmem:[#allocation8 + $0x434] sm:$0xf]  ;;  %v4003_v41 = vld [vmem:[#allocation8 + $0x8c8] sm:$0xf0]  ;;  %v3403_v47 = vld [vmem:[#allocation8 + $0x418] sm:$0xf0] }
 0x21d   : > { %v4265_v35 = vld [vmem:[#allocation8 + $0x734] sm:$0xf]  ;;  %v3739_v17 = vld [vmem:[#allocation8 + $0x6b8] sm:$0xf0]  ;;  %v4295_v18 = vld [vmem:[#allocation8 + $0x824] sm:$0xf] }
 0x21e   : > { %2568 = vmatpush.bf16.msrb.mxu0 %v3786_v62  ;;  %2581 = vmatpush.bf16.msrb.mxu1 %v3978_v63  ;;  %v2355_v58 = vadd.f32 %v2354_v43, %v2342_v46  ;;  %v4286_v62 = vld [vmem:[#allocation8 + $0x7d4] sm:$0xf0]  ;;  %v4043_v63 = vld [vmem:[#allocation8 + $0x44] sm:$0xf]  ;;  %v3811_v43 = vld [vmem:[#allocation8 + $0x748] sm:$0xf0]  ;;  %v3622_v46 = vor.u32 %v4217_v33, %v3619_v34 }
 0x21f   : > { %2594 = vmatpush.bf16.msrb.mxu2 %v3022_v4  ;;  %2607 = vmatpush.bf16.msrb.mxu3 %v3214_v5  ;;  %v3665_v4 = vld [vmem:[#allocation8 + $0x610] sm:$0xf]  ;;  %v4232_v5 = vld [vmem:[#allocation8 + $0x624] sm:$0xf0]  ;;  %v3882_v7 = vor.u32 %v4286_v62, %v3881_v61  ;;  %v2926_v10 = vor.u32 %v4043_v63, %v2923_v0  ;;  %v3406_v61 = vor.u32 %v4163_v44, %v3403_v47  ;;  %v4157_v63 = vld [vmem:[#allocation8 + $0x3d4] sm:$0xf] }
 0x220   : > { %v2677_v3 = vadd.f32 %v2671_v48, %v2355_v58  ;;  %v3666_v22 = vor.u32 %v4232_v5, %v3665_v4  ;;  %v3814_v48 = vor.u32 %v4265_v35, %v3811_v43  ;;  %v3787_v58 = vld [vmem:[#allocation8 + $0x718] sm:$0xf0]  ;;  %v3379_v0 = vld [vmem:[#allocation8 + $0x3e8] sm:$0xf0]  ;;  %v4253_v5 = vld [vmem:[#allocation8 + $0x6d4] sm:$0xf] }
 0x221   : > { %v3790_v1 = vor.u32 %v4259_v57, %v3787_v58  ;;  %v3571_v4 = vld [vmem:[#allocation8 + $0x568] sm:$0xf0]  ;;  %v4139_v43 = vld [vmem:[#allocation8 + $0x344] sm:$0xf]  ;;  %v3499_v44 = vld [vmem:[#allocation8 + $0x4d8] sm:$0xf0] }
 0x222   : > { %2569 = vmatpush.bf16.msrb.mxu0 %v3762_v14  ;;  %2582 = vmatpush.bf16.msrb.mxu1 %v3954_v15  ;;  %2683 = vst [vmem:[%s4971_s14 + $0x8] sm:$0xff] %v2677_v3  ;;  %v4205_v3 = vld [vmem:[#allocation8 + $0x554] sm:$0xf]  ;;  %v4235_v47 = vld [vmem:[#allocation8 + $0x644] sm:$0xf] }
 0x223   : > { %2595 = vmatpush.bf16.msrb.mxu2 %v2998_v19  ;;  %2608 = vmatpush.bf16.msrb.mxu3 %v3190_v20  ;;  %v2343_v14 = vpop.f32.mrf.mxu2  ;;  %v2356_v15 = vpop.f32.mrf.mxu3  ;;  %v4223_v19 = vld [vmem:[#allocation8 + $0x5e4] sm:$0xf]  ;;  %v3643_v20 = vld [vmem:[#allocation8 + $0x5f8] sm:$0xf0] }
 0x224   : > { %v3646_v30 = vor.u32 %v4223_v19, %v3643_v20  ;;  %v4199_v14 = vld [vmem:[#allocation8 + $0x524] sm:$0xf]  ;;  %v3547_v15 = vld [vmem:[#allocation8 + $0x538] sm:$0xf0] }
 0x225   : > { %v3931_v19 = vld [vmem:[#allocation8 + $0x838] sm:$0xf0] }
 0x226   : > { %2570 = vmatpush.bf16.msrb.mxu0 %v3738_v27  ;;  %2583 = vmatpush.bf16.msrb.mxu1 %v3930_v28  ;;  %v2902_v27 = vor.u32 %v4037_v9, %v2899_v12  ;;  %v3094_v28 = vor.u32 %v4085_v13, %v3091_v16  ;;  %v3574_v9 = vor.u32 %v4205_v3, %v3571_v4  ;;  %v4247_v16 = vld [vmem:[#allocation8 + $0x6a4] sm:$0xf]  ;;  %v3667_v4 = vld [vmem:[#allocation8 + $0x628] sm:$0xf0] }
 0x227   : > { %2596 = vmatpush.bf16.msrb.mxu2 %v2974_v32  ;;  %2609 = vmatpush.bf16.msrb.mxu3 %v3166_v37  ;;  %v3427_v32 = vld [vmem:[#allocation8 + $0x448] sm:$0xf0]  ;;  %v3838_v37 = vor.u32 %v4271_v21, %v3835_v24  ;;  %v3550_v21 = vor.u32 %v4199_v14, %v3547_v15  ;;  %v3742_v24 = vor.u32 %v4247_v16, %v3739_v17  ;;  %v2672_v16 = vld [vmem:[%s4844_s17 + $0x10] sm:$0xff] }
 0x228   : > { %v3430_v42 = vor.u32 %v4169_v31, %v3427_v32  ;;  %v3934_v25 = vor.u32 %v4295_v18, %v3931_v19  ;;  %v3715_v31 = vld [vmem:[#allocation8 + $0x688] sm:$0xf0]  ;;  %v4289_v32 = vld [vmem:[#allocation8 + $0x7f4] sm:$0xf] }
 0x22a   : > { %2571 = vmatpush.bf16.msrb.mxu0 %v3714_v54  ;;  %2584 = vmatpush.bf16.msrb.mxu1 %v3906_v55  ;;  %v4006_v54 = vor.u32 %v4313_v36, %v4003_v41  ;;  %v4211_v55 = vld [vmem:[#allocation8 + $0x584] sm:$0xf]  ;;  %v3307_v36 = vld [vmem:[#allocation8 + $0x358] sm:$0xf0] }
 0x22b   : > { %2597 = vmatpush.bf16.msrb.mxu2 %v2950_v59  ;;  %2610 = vmatpush.bf16.msrb.mxu3 %v3142_v60  ;;  %v4307_v59 = vld [vmem:[#allocation8 + $0x884] sm:$0xf]  ;;  %v3979_v60 = vld [vmem:[#allocation8 + $0x898] sm:$0xf0]  ;;  %v3598_v62 = vor.u32 %v4211_v55, %v3595_v56  ;;  %v752_v56 = vperm.slane %v4962_v45, 2  ;;  %v3310_v57 = vor.u32 %v4139_v43, %v3307_v36 }
 0x22c   : > { %v3982_v2 = vor.u32 %v4307_v59, %v3979_v60  ;;  %v3883_v55 = vld [vmem:[#allocation8 + $0x7d8] sm:$0xf0]  ;;  %v4133_v59 = vld [vmem:[#allocation8 + $0x314] sm:$0xf]  ;;  %v3283_v60 = vld [vmem:[#allocation8 + $0x328] sm:$0xf0] }
 0x22e   : > { %2572 = vmatpush.bf16.msrb.mxu0 %v3690_v6  ;;  %2585 = vmatpush.bf16.msrb.mxu1 %v3882_v7  ;;  %v3763_v6 = vld [vmem:[#allocation8 + $0x6e8] sm:$0xf0]  ;;  %v4301_v7 = vld [vmem:[#allocation8 + $0x854] sm:$0xf] }
 0x22f   : > { %2598 = vmatpush.bf16.msrb.mxu2 %v2926_v10  ;;  %2611 = vmatpush.bf16.msrb.mxu3 %v3118_v11  ;;  %v4151_v10 = vld [vmem:[#allocation8 + $0x3a4] sm:$0xf]  ;;  %v3355_v11 = vld [vmem:[#allocation8 + $0x3b8] sm:$0xf0]  ;;  %v3766_v12 = vor.u32 %v4253_v5, %v3763_v6  ;;  %v3958_v13 = vor.u32 %v4301_v7, %v3955_v8  ;;  %v4277_v5 = vld [vmem:[#allocation8 + $0x794] sm:$0xf]  ;;  %v3286_v7 = vor.u32 %v4133_v59, %v3283_v60 }
 0x230   : > { %v3358_v20 = vor.u32 %v4151_v10, %v3355_v11  ;;  %v3859_v6 = vld [vmem:[#allocation8 + $0x7a8] sm:$0xf0] }
 0x232   : > { %2573 = vmatpush.bf16.msrb.mxu0 %v3666_v22  ;;  %2586 = vmatpush.bf16.msrb.mxu1 %v3858_v23  ;;  %v4985_v50 = vpop.f32.mrf.mxu0  ;;  %v4145_v22 = vld [vmem:[#allocation8 + $0x374] sm:$0xf]  ;;  %v3331_v23 = vld [vmem:[#allocation8 + $0x388] sm:$0xf0] }
 0x233   : > { %2599 = vmatpush.bf16.msrb.mxu2 %v2902_v27  ;;  %2612 = vmatpush.bf16.msrb.mxu3 %v3094_v28  ;;  %v3523_v27 = vld [vmem:[#allocation8 + $0x508] sm:$0xf0]  ;;  %v4241_v28 = vld [vmem:[#allocation8 + $0x674] sm:$0xf]  ;;  %v3334_v34 = vor.u32 %v4145_v22, %v3331_v23  ;;  %v2368_v10 = vadd.f32 %v4985_v50, %v752_v56 }
 0x234   : > { %v3526_v35 = vor.u32 %v4193_v26, %v3523_v27  ;;  %v3718_v41 = vor.u32 %v4241_v28, %v3715_v31 }
 0x235   : > { %2574 = vmatmul.bf16.vlgmr.msrb.gmra.mxu0 %v4940_v39  ;;  %2587 = vmatmul.bf16.vlgmr.msrb.gmra.mxu1 %v4944_v40 }
 0x236   : > { %2618 = vmatpush.bf16.msra.mxu0 %v3454_v29  ;;  %2631 = vmatpush.bf16.msra.mxu1 %v3646_v30 }
 0x237   : > { %2644 = vmatpush.bf16.msra.mxu2 %v3838_v37  ;;  %2657 = vmatpush.bf16.msra.mxu3 %v4030_v38  ;;  %v3907_v37 = vld [vmem:[#allocation8 + $0x808] sm:$0xf0] }
 0x238   : > { %2600 = vmatmul.bf16.vlgmr.msrb.gmra.mxu2 %v4917_v49  ;;  %2613 = vmatmul.bf16.vlgmr.msrb.gmra.mxu3 %v4919_v51  ;;  %v4987_v49 = vpop.f32.mrf.mxu1  ;;  %v3382_v51 = vor.u32 %v4157_v63, %v3379_v0  ;;  %v4181_v63 = vld [vmem:[#allocation8 + $0x494] sm:$0xf]  ;;  %v3475_v0 = vld [vmem:[#allocation8 + $0x4a8] sm:$0xf0] }
 0x239   : > { %v3478_v8 = vor.u32 %v4181_v63, %v3475_v0  ;;  %v2381_v11 = vadd.f32 %v4987_v49, %v2368_v10 }
 0x23a   : > { %2619 = vmatpush.bf16.msra.mxu0 %v3430_v42  ;;  %2632 = vmatpush.bf16.msra.mxu1 %v3622_v46  ;;  %v2369_v38 = vpop.f32.mrf.mxu0  ;;  %v3910_v42 = vor.u32 %v4289_v32, %v3907_v37  ;;  %v4187_v46 = vld [vmem:[#allocation8 + $0x4c4] sm:$0xf] }
 0x23b   : > { %2645 = vmatpush.bf16.msra.mxu2 %v3814_v48  ;;  %2658 = vmatpush.bf16.msra.mxu3 %v4006_v54  ;;  %v2393_v29 = vpop.f32.mrf.mxu2  ;;  %v2406_v30 = vpop.f32.mrf.mxu3  ;;  %v3691_v48 = vld [vmem:[#allocation8 + $0x658] sm:$0xf0]  ;;  %v4283_v54 = vld [vmem:[#allocation8 + $0x7c4] sm:$0xf]  ;;  %v3502_v58 = vor.u32 %v4187_v46, %v3499_v44 }
 0x23e   : > { %2620 = vmatpush.bf16.msra.mxu0 %v3406_v61  ;;  %2633 = vmatpush.bf16.msra.mxu1 %v3598_v62  ;;  %v3694_v61 = vor.u32 %v4235_v47, %v3691_v48  ;;  %v3886_v62 = vor.u32 %v4283_v54, %v3883_v55 }
 0x23f   : > { %2646 = vmatpush.bf16.msra.mxu2 %v3790_v1  ;;  %2659 = vmatpush.bf16.msra.mxu3 %v3982_v2  ;;  %v4229_v1 = vld [vmem:[#allocation8 + $0x614] sm:$0xf] }
 0x240   : > { %v2382_v33 = vpop.f32.mrf.mxu1 }
 0x242   : > { %2621 = vmatpush.bf16.msra.mxu0 %v3382_v51  ;;  %2634 = vmatpush.bf16.msra.mxu1 %v3574_v9  ;;  %v3670_v51 = vor.u32 %v4229_v1, %v3667_v4  ;;  %v3862_v9 = vor.u32 %v4277_v5, %v3859_v6 }
 0x243   : > { %2647 = vmatpush.bf16.msra.mxu2 %v3766_v12  ;;  %2660 = vmatpush.bf16.msra.mxu3 %v3958_v13  ;;  %v2395_v2 = vpop.f32.mrf.mxu2  ;;  %v2408_v3 = vpop.f32.mrf.mxu3  ;;  %v2394_v12 = vadd.f32 %v2393_v29, %v2381_v11 }
 0x245   : > { %v2407_v50 = vadd.f32 %v2406_v30, %v2394_v12 }
 0x246   : > { %2622 = vmatpush.bf16.msra.mxu0 %v3358_v20  ;;  %2635 = vmatpush.bf16.msra.mxu1 %v3550_v21 }
 0x247   : > { %2648 = vmatpush.bf16.msra.mxu2 %v3742_v24  ;;  %2661 = vmatpush.bf16.msra.mxu3 %v3934_v25 }
 0x24a   : > { %2623 = vmatpush.bf16.msra.mxu0 %v3334_v34  ;;  %2636 = vmatpush.bf16.msra.mxu1 %v3526_v35 }
 0x24b   : > { %2649 = vmatpush.bf16.msra.mxu2 %v3718_v41  ;;  %2662 = vmatpush.bf16.msra.mxu3 %v3910_v42 }
 0x24e   : > { %2624 = vmatpush.bf16.msra.mxu0 %v3310_v57  ;;  %2637 = vmatpush.bf16.msra.mxu1 %v3502_v58 }
 0x24f   : > { %2650 = vmatpush.bf16.msra.mxu2 %v3694_v61  ;;  %2663 = vmatpush.bf16.msra.mxu3 %v3886_v62 }
 0x252   : > { %2625 = vmatpush.bf16.msra.mxu0 %v3286_v7  ;;  %2638 = vmatpush.bf16.msra.mxu1 %v3478_v8  ;;  %v2419_v13 = vpop.f32.mrf.mxu0  ;;  %v2432_v14 = vpop.f32.mrf.mxu1 }
 0x253   : > { %2651 = vmatpush.bf16.msra.mxu2 %v3670_v51  ;;  %2664 = vmatpush.bf16.msra.mxu3 %v3862_v9  ;;  %v2420_v15 = vadd.f32 %v2419_v13, %v2407_v50 }
 0x255   : > { %2626 = vmatmul.bf16.vlgmr.msra.gmra.mxu0 %v4921_v52  ;;  %2639 = vmatmul.bf16.vlgmr.msra.gmra.mxu1 %v4923_v53  ;;  %v2433_v17 = vadd.f32 %v2432_v14, %v2420_v15 }
 0x256   : > { %2652 = vmatmul.bf16.vlgmr.msra.gmra.mxu2 %v4940_v39  ;;  %2665 = vmatmul.bf16.vlgmr.msra.gmra.mxu3 %v4944_v40 }
 0x257   : > { %v2678_v52 = vadd.f32 %v2672_v16, %v2433_v17 }
 0x259   : > { %2684 = vst [vmem:[%s4971_s14 + $0x10] sm:$0xff] %v2678_v52 }
 0x25a   : > { %v2421_v40 = vpop.f32.mrf.mxu0  ;;  %v2434_v49 = vpop.f32.mrf.mxu1 }
 0x25b   : > { %v2445_v53 = vpop.f32.mrf.mxu2  ;;  %v2458_v39 = vpop.f32.mrf.mxu3 }
 0x25c   : > { %4603 = shalt.err (!%p4600_p9)
}
 0x25d   : > { %4347 = dma.vmem_to_hbm [thread:$0]  (%p4808_p5), %s2723_s7, 768, %s2725_s8, %s2694_s10   ;;  %v753_v20 = vperm.slane %v4962_v45, 3  ;;  %v2673_v32 = vld [vmem:[%s4844_s17 + $0x18] sm:$0xff]  ;;  %v754_v44 = vperm.slane %v4962_v45, 4  ;;  %v2674_v61 = vld [vmem:[%s4844_s17 + $0x20] sm:$0xff]  ;;  %v755_v6 = vperm.slane %v4962_v45, 5 }
 0x25e   : > { %s2705_s30 = scalar_lea.hbm %s5065_s5, %s4326_s19  ;;  %v2675_v45 = vld [vmem:[%s4844_s17 + $0x28] sm:$0xff]  ;;  %s2707_s7 = sshll.u32 %s4971_s14, 4  ;;  %s2708_s7 = int_to_ptr.vmem [resolvable:$true] %s2707_s7 }
 0x25f   : > { %v2446_v21 = vadd.f32 %v2445_v53, %v753_v20  ;;  %s2709_s8 = sshll.u32 %s2705_s30, 4  ;;  %s2689_s28 = scalar_lea.sflag [#allocation4], %s4837_s11  ;;  %s2710_s8 = int_to_ptr.hbm [resolvable:$true] %s2709_s8 }
 0x260   : > { %s4618_s10 = sshra.s32 %s2710_s8, 4  ;;  %s4624_s17 = scalar_lea.hbm %s5065_s5, 96  ;;  %s4619_s10 = int_to_ptr.hbm [resolvable:$true] %s4618_s10 }
 0x261   : > { %v2459_v22 = vadd.f32 %v2458_v39, %v2446_v21  ;;  %s4620_s19 = scalar_lea.hbm %s4619_s10, 48  ;;  %p4625_p0 = scmp.lt.s32.totalorder %s4619_s10, %s5065_s5 }
 0x262   : > { %p4621_p10 = scmp.ne.s32.totalorder %s4619_s10, %s4620_s19  ;;  %p4626_p2 = scmp.lt.s32.totalorder %s4624_s17, %s4620_s19 }
 0x263   : > { %v2447_v18 = vpop.f32.mrf.mxu2  ;;  %v2460_v19 = vpop.f32.mrf.mxu3 }
 0x264   : > { %p4622_p11 = pnand %p4621_p10, %p4808_p5  ;;  %p4627_p1 = por %p4626_p2, %p4625_p0 }
 0x266   : > { %p4623_p13 = pneg %p4622_p11 }
 0x268   : > { %p4628_p3 = pnand %p4627_p1, %p4623_p13 }
 0x272   : > { %v2471_v23 = vpop.f32.mrf.mxu0  ;;  %v2484_v24 = vpop.f32.mrf.mxu1 }
 0x273   : > { %v2472_v25 = vadd.f32 %v2471_v23, %v2459_v22 }
 0x275   : > { %v2485_v26 = vadd.f32 %v2484_v24, %v2472_v25 }
 0x27a   : > { %v2473_v30 = vpop.f32.mrf.mxu0  ;;  %v2486_v31 = vpop.f32.mrf.mxu1 }
 0x27b   : > { %v2497_v27 = vpop.f32.mrf.mxu2  ;;  %v2510_v28 = vpop.f32.mrf.mxu3 }
 0x27c   : > { %v2498_v29 = vadd.f32 %v2497_v27, %v2485_v26 }
 0x27e   : > { %v2511_v37 = vadd.f32 %v2510_v28, %v2498_v29 }
 0x280   : > { %v2679_v38 = vadd.f32 %v2673_v32, %v2511_v37 }
 0x282   : > { %2685 = vst [vmem:[%s4971_s14 + $0x18] sm:$0xff] %v2679_v38 }
 0x283   : > { %v2499_v33 = vpop.f32.mrf.mxu2  ;;  %v2512_v34 = vpop.f32.mrf.mxu3 }
 0x292   : > { %v2523_v35 = vpop.f32.mrf.mxu0  ;;  %v2536_v43 = vpop.f32.mrf.mxu1 }
 0x293   : > { %v2524_v54 = vadd.f32 %v2523_v35, %v754_v44 }
 0x295   : > { %v2537_v55 = vadd.f32 %v2536_v43, %v2524_v54 }
 0x29a   : > { %v2525_v42 = vpop.f32.mrf.mxu0  ;;  %v2538_v46 = vpop.f32.mrf.mxu1 }
 0x29b   : > { %v2549_v36 = vpop.f32.mrf.mxu2  ;;  %v2562_v41 = vpop.f32.mrf.mxu3 }
 0x29c   : > { %v2550_v56 = vadd.f32 %v2549_v36, %v2537_v55 }
 0x29e   : > { %v2563_v57 = vadd.f32 %v2562_v41, %v2550_v56 }
 0x2a3   : > { %v2551_v47 = vpop.f32.mrf.mxu2  ;;  %v2564_v48 = vpop.f32.mrf.mxu3 }
 0x2b2   : > { %v2575_v58 = vpop.f32.mrf.mxu0  ;;  %v2588_v59 = vpop.f32.mrf.mxu1 }
 0x2b3   : > { %v2576_v60 = vadd.f32 %v2575_v58, %v2563_v57 }
 0x2b5   : > { %v2589_v62 = vadd.f32 %v2588_v59, %v2576_v60 }
 0x2b7   : > { %v2680_v63 = vadd.f32 %v2674_v61, %v2589_v62 }
 0x2b9   : > { %2686 = vst [vmem:[%s4971_s14 + $0x20] sm:$0xff] %v2680_v63 }
 0x2ba   : > { %v2577_v2 = vpop.f32.mrf.mxu0  ;;  %v2590_v3 = vpop.f32.mrf.mxu1 }
 0x2bb   : > { %v2601_v0 = vpop.f32.mrf.mxu2  ;;  %v2614_v1 = vpop.f32.mrf.mxu3 }
 0x2bc   : > { %v2602_v7 = vadd.f32 %v2601_v0, %v755_v6 }
 0x2be   : > { %v2615_v8 = vadd.f32 %v2614_v1, %v2602_v7 }
 0x2c3   : > { %v2603_v4 = vpop.f32.mrf.mxu2  ;;  %v2616_v5 = vpop.f32.mrf.mxu3 }
 0x2d2   : > { %v2627_v51 = vpop.f32.mrf.mxu0  ;;  %v2640_v9 = vpop.f32.mrf.mxu1 }
 0x2d3   : > { %v2628_v10 = vadd.f32 %v2627_v51, %v2615_v8 }
 0x2d5   : > { %v2641_v11 = vadd.f32 %v2640_v9, %v2628_v10 }
 0x2d9   : > { %v2653_v12 = vpop.f32.mrf.mxu2  ;;  %v2666_v50 = vpop.f32.mrf.mxu3 }
 0x2da   : > { %v2654_v13 = vadd.f32 %v2653_v12, %v2641_v11  ;;  %v2629_v14 = vpop.f32.mrf.mxu0  ;;  %v2642_v15 = vpop.f32.mrf.mxu1 }
 0x2dc   : > { %v2667_v16 = vadd.f32 %v2666_v50, %v2654_v13 }
 0x2de   : > { %v2681_v17 = vadd.f32 %v2675_v45, %v2667_v16 }
 0x2e0   : > { %2687 = vst [vmem:[%s4971_s14 + $0x28] sm:$0xff] %v2681_v17 }
 0x2e1   : > { %v2655_v52 = vpop.f32.mrf.mxu2  ;;  %v2668_v53 = vpop.f32.mrf.mxu3 }
 0x2e2   : > { %4631 = shalt.err (!%p4628_p3)
}
 0x2e3   : > { %4346 = dma.vmem_to_hbm [thread:$0]  (%p4808_p5), %s2708_s7, 768, %s2710_s8, %s2689_s28  }
 0x2e4 PF: > { %s2736_s11 = sand.u32 1, %s4670_s21   ;;  %p5077_p4 = scmp.ge.s32.totalorder %s4682_s24, 2 }
 0x2e5   : > { %s2737_s14 = scalar_lea.sflag [#allocation4], %s2736_s11 }
 0x2e6   : > { %p4368_p12 = pnand %p5077_p4, %p4812_p6 }
 0x2e8   : > { %p4369_p7 = pneg %p4368_p12 }
 0x2ea   : > { %4661 = dma.done.wait (%p4369_p7), %s2737_s14, 768  }
 0x2eb   : > { %4663 = vsyncadd (%p4369_p7), %s2737_s14, 4294966528  ;;  %s2747_s1 = scalar_lea.sflag [#allocation13], %s2736_s11 }
 0x2ec   : > { %4665 = dma.done.wait (%p4369_p7), %s2747_s1, 768  }
 0x2ed   : > { %4667 = vsyncadd (%p4369_p7), %s2747_s1, 4294966528  ;;  %p25_p5 = scmp.ge.s32.totalorder %s4786_s9, 4   ;;  %s5078_s21 = smov %s4674_s22 }
 0x2ee   : > { %s5079_s22 = smov %s4678_s23  ;;  %s5080_s23 = smov %s4797_s13 }
 0x2ef   : > { %s5081_s24 = smov %s4786_s9  ;;  %27 = sbr.rel (!%p25_p5) target bundleno = 12 (0xc), region = 118 }
 0x2f4   :  { %2753 = vsyncpa [#allocation3], 1 }
 0x2f5   :  { %2755 = vsyncpa [#allocation3 + $0x1], 1 }
 0x2f6   :  { %2756 = vsyncpa [#allocation6], 1 }
 0x2f7   :  { %2757 = vsyncpa [#allocation9], 1 }
 0x2f8   :  { %2758 = vsyncpa [#allocation4], 1 }
 0x2f9   :  { %2760 = vsyncpa [#allocation4 + $0x1], 1 }
 0x2fa   :  { %2761 = vsyncpa [#allocation13], 1 }
 0x2fb   :  { %2763 = vsyncpa [#allocation13 + $0x1], 1 }

</bundles_post_ra>
